<compile_context>
chip_gen: v5e
topology: v5e:2x2
jax: 0.10.0
libtpu: 0.0.40
codegen_flags: <defaults>
</compile_context>

<pallas_src>
import functools

import numpy as np
import jax
import jax.numpy as jnp
from jax import lax
from jax.experimental import pallas as pl
from jax.experimental.pallas import tpu as pltpu


# ----------------------------- tiling config -------------------------------

TM, TN, TK = 256, 256, 512          # matmul tile targets (fit v7x 64 MiB VMEM)
TROW = 512                          # row tile for LN / layer aggregation
VMEM_LIMIT_BYTES = 48 * 1024 * 1024
MASK_VALUE = -1e30


def _ceil_to(x, m):
    return ((x + m - 1) // m) * m


def _pad2(a, rows, cols):
    pr, pc = rows - a.shape[0], cols - a.shape[1]
    if pr or pc:
        a = jnp.pad(a, ((0, pr), (0, pc)))
    return a


def _gelu(y):
    # TODO(synk): reference nn.GELU() default is erf-based; tanh approximation
    # is used here for guaranteed Mosaic lowering (differs at the ~1e-3 level).
    return jax.nn.gelu(y, approximate=True)


# ------------------------- tiled linear (matmul) ----------------------------

def _linear_kernel(*refs, n_k, fuse_ln, activation, has_bias, has_residual, eps):
    single_k = (n_k == 1)
    it = iter(refs)
    x_ref = next(it)
    w_ref = next(it)
    b_ref = next(it) if has_bias else None
    if fuse_ln:
        g_ref = next(it)
        be_ref = next(it)
    r_ref = next(it) if has_residual else None
    o_ref = next(it)
    acc_ref = None if single_k else next(it)

    if fuse_ln:
        # LayerNorm fused onto the input tile (only valid when tk == K).
        x = x_ref[...].astype(jnp.float32)
        mu = jnp.mean(x, axis=-1, keepdims=True)
        var = jnp.mean(jnp.square(x - mu), axis=-1, keepdims=True)
        x = (x - mu) * lax.rsqrt(var + eps)
        x = x * g_ref[...].astype(jnp.float32) + be_ref[...].astype(jnp.float32)
        x_op = x.astype(jnp.bfloat16)
    else:
        x_op = x_ref[...].astype(jnp.bfloat16)

    partial = jnp.dot(x_op, w_ref[...].astype(jnp.bfloat16),
                      preferred_element_type=jnp.float32)

    def _epilogue(y):
        if has_bias:
            y = y + b_ref[...].astype(jnp.float32)
        if activation is not None:
            y = activation(y)
        if has_residual:
            y = y + r_ref[...].astype(jnp.float32)
        o_ref[...] = y.astype(o_ref.dtype)

    if single_k:
        # K fits in one tile: no accumulator round-trip through VMEM scratch.
        _epilogue(partial)
    else:
        k = pl.program_id(2)

        @pl.when(k == 0)
        def _():
            acc_ref[...] = jnp.zeros_like(acc_ref)

        acc_ref[...] += partial

        @pl.when(k == n_k - 1)
        def _():
            _epilogue(acc_ref[...])


def linear(x, w, b=None, activation=None, residual=None, ln=None, eps=1e-5):
    """y = act(LN?(x) @ w + b) + residual, tiled over (M, N, K)."""
    lead = x.shape[:-1]
    K = x.shape[-1]
    N = w.shape[1]
    x2 = x.reshape(-1, K)
    M = x2.shape[0]

    tk = K if K <= TK else TK
    if ln is not None and tk != K:
        # K is tiled -> cannot normalize inside the matmul; use the row-tiled LN.
        x2 = layernorm(x2, ln[0], ln[1], eps)
        ln = None
    tm = M if M <= TM else TM
    tn = N if N <= TN else TN
    Mp, Np, Kp = _ceil_to(M, tm), _ceil_to(N, tn), _ceil_to(K, tk)
    n_k = Kp // tk
    single_k = (n_k == 1)

    operands = [_pad2(x2, Mp, Kp), _pad2(w, Kp, Np)]
    in_specs = [pl.BlockSpec((tm, tk), lambda i, j, k: (i, k)),
                pl.BlockSpec((tk, tn), lambda i, j, k: (k, j))]

    has_bias = b is not None
    if has_bias:
        operands.append(_pad2(b.reshape(1, N), 1, Np))
        in_specs.append(pl.BlockSpec((1, tn), lambda i, j, k: (0, j)))

    fuse_ln = ln is not None
    if fuse_ln:
        operands += [ln[0].reshape(1, K), ln[1].reshape(1, K)]
        in_specs += [pl.BlockSpec((1, K), lambda i, j, k: (0, 0)),
                     pl.BlockSpec((1, K), lambda i, j, k: (0, 0))]

    has_residual = residual is not None
    if has_residual:
        operands.append(_pad2(residual.reshape(-1, N), Mp, Np))
        in_specs.append(pl.BlockSpec((tm, tn), lambda i, j, k: (i, j)))

    out = pl.pallas_call(
        functools.partial(_linear_kernel, n_k=n_k, fuse_ln=fuse_ln,
                          activation=activation, has_bias=has_bias,
                          has_residual=has_residual, eps=eps),
        out_shape=jax.ShapeDtypeStruct((Mp, Np), x.dtype),
        grid=(Mp // tm, Np // tn, n_k),
        in_specs=in_specs,
        out_specs=pl.BlockSpec((tm, tn), lambda i, j, k: (i, j)),
        scratch_shapes=[] if single_k else [pltpu.VMEM((tm, tn), jnp.float32)],
        compiler_params=pltpu.CompilerParams(
            dimension_semantics=("parallel", "parallel", "arbitrary"),
            vmem_limit_bytes=VMEM_LIMIT_BYTES),
    )(*operands)

    out = out[:M, :N]
    return out.reshape(*lead, N)


# --------------------- row-tiled layernorm (fallback) -----------------------

def _layernorm_kernel(x_ref, g_ref, b_ref, o_ref, *, eps):
    x = x_ref[...].astype(jnp.float32)
    mu = jnp.mean(x, axis=-1, keepdims=True)
    var = jnp.mean(jnp.square(x - mu), axis=-1, keepdims=True)
    y = (x - mu) * lax.rsqrt(var + eps)
    o_ref[...] = (y * g_ref[...] + b_ref[...]).astype(o_ref.dtype)


def layernorm(x, g, b, eps=1e-5):
    """Row-tiled LayerNorm (only used when d_model does not fit in one K tile)."""
    lead = x.shape[:-1]
    D = x.shape[-1]
    x2 = x.reshape(-1, D)
    N = x2.shape[0]
    tm = N if N <= TROW else TROW
    Np = _ceil_to(N, tm)
    if Np != N:
        x2 = jnp.pad(x2, ((0, Np - N), (0, 0)))
    out = pl.pallas_call(
        functools.partial(_layernorm_kernel, eps=eps),
        out_shape=jax.ShapeDtypeStruct((Np, D), x.dtype),
        grid=(Np // tm,),
        in_specs=[pl.BlockSpec((tm, D), lambda i: (i, 0)),
                  pl.BlockSpec((1, D), lambda i: (0, 0)),
                  pl.BlockSpec((1, D), lambda i: (0, 0))],
        out_specs=pl.BlockSpec((tm, D), lambda i: (i, 0)),
        compiler_params=pltpu.CompilerParams(
            dimension_semantics=("parallel",),
            vmem_limit_bytes=VMEM_LIMIT_BYTES),
    )(x2, g.reshape(1, D), b.reshape(1, D))
    return out[:N].reshape(*lead, D)


# ------------------------- fused attention kernel ---------------------------

def _attention_kernel(q_ref, sk_ref, sv_ref, mk_ref, mv_ref, bm_ref, bs_ref,
                      o_ref, *, n_head, d_head):
    # Lane-packed layout: all heads of one batch element per grid step.
    # The causal mask is already folded into bs_ref (self-bias) at trace time,
    # so the kernel body is pure matmul + softmax work.
    q_all = q_ref[0]           # (S, H*dh)   (q scale already folded into w_q)
    sk_all = sk_ref[0]         # (S, H*dh)
    sv_all = sv_ref[0]
    mk_all = mk_ref[0]         # (Mlen, H*dh)
    mv_all = mv_ref[0]

    outs = []
    for h in range(n_head):                       # static unroll (small H)
        sl = slice(h * d_head, (h + 1) * d_head)
        q = q_all[:, sl].astype(jnp.bfloat16)
        sk = sk_all[:, sl].astype(jnp.bfloat16)
        sv = sv_all[:, sl].astype(jnp.bfloat16)
        mk = mk_all[:, sl].astype(jnp.bfloat16)
        mv = mv_all[:, sl].astype(jnp.bfloat16)

        # logits against memory keys (always visible) and self keys
        # (causal mask is baked into the self bias block).
        sim_m = lax.dot_general(q, mk, (((1,), (1,)), ((), ())),
                                preferred_element_type=jnp.float32) + bm_ref[h]
        sim_s = lax.dot_general(q, sk, (((1,), (1,)), ((), ())),
                                preferred_element_type=jnp.float32) + bs_ref[h]

        # combined two-block softmax (no concat of mem/self logits needed)
        m = jnp.maximum(jnp.max(sim_m, axis=-1, keepdims=True),
                        jnp.max(sim_s, axis=-1, keepdims=True))
        p_m = jnp.exp(sim_m - m)
        p_s = jnp.exp(sim_s - m)
        denom = (jnp.sum(p_m, axis=-1, keepdims=True) +
                 jnp.sum(p_s, axis=-1, keepdims=True))
        o = jnp.dot(p_m.astype(jnp.bfloat16), mv,
                    preferred_element_type=jnp.float32)
        o = o + jnp.dot(p_s.astype(jnp.bfloat16), sv,
                        preferred_element_type=jnp.float32)
        outs.append(o * pl.reciprocal(denom, approx=True))

    # single lane-dense store of all heads
    o_ref[0] = jnp.concatenate(outs, axis=-1).astype(o_ref.dtype)


def attention(q, self_k, self_v, mem_k, mem_v, bias_mem, bias_self,
              n_head, d_head):
    """All tensors lane-packed: q/self_k/self_v (B,S,H*dh); mem_* (B,M,H*dh);
    bias_mem (H,S,M); bias_self (H,S,S).  Returns (B,S,H*dh)."""
    B, S, HD = q.shape
    M = mem_k.shape[1]
    H = n_head

    # Fold the causal mask into the self-bias once (trace time, tiny (H,S,S)),
    # removing the per-head iota/select from the kernel body.
    causal = (jnp.arange(S)[:, None] >= jnp.arange(S)[None, :])
    bias_self = jnp.where(causal[None], bias_self.astype(jnp.float32),
                          MASK_VALUE)
    bias_mem = bias_mem.astype(jnp.float32)

    # TODO(synk): for very long segments add a T-axis grid with online softmax;
    # feedback-transformer segments (tgt_len) are short so full-S/T blocks fit.
    return pl.pallas_call(
        functools.partial(_attention_kernel, n_head=n_head, d_head=d_head),
        out_shape=jax.ShapeDtypeStruct((B, S, HD), q.dtype),
        grid=(B,),
        in_specs=[
            pl.BlockSpec((1, S, HD), lambda b: (b, 0, 0)),   # q
            pl.BlockSpec((1, S, HD), lambda b: (b, 0, 0)),   # self k
            pl.BlockSpec((1, S, HD), lambda b: (b, 0, 0)),   # self v
            pl.BlockSpec((1, M, HD), lambda b: (b, 0, 0)),   # mem k
            pl.BlockSpec((1, M, HD), lambda b: (b, 0, 0)),   # mem v
            pl.BlockSpec((H, S, M), lambda b: (0, 0, 0)),    # bias (resident)
            pl.BlockSpec((H, S, S), lambda b: (0, 0, 0)),    # bias (resident)
        ],
        out_specs=pl.BlockSpec((1, S, HD), lambda b: (b, 0, 0)),
        compiler_params=pltpu.CompilerParams(
            dimension_semantics=("parallel",),
            vmem_limit_bytes=VMEM_LIMIT_BYTES),
    )(q, self_k, self_v, mem_k, mem_v, bias_mem, bias_self)


# ----------------------- layer-weighted aggregation -------------------------

def _wsum_kernel(w_ref, h_ref, o_ref):
    n_layers = h_ref.shape[0]
    acc = h_ref[0].astype(jnp.float32) * w_ref[0]
    for l in range(1, n_layers):                  # static unroll, L is tiny
        acc = acc + h_ref[l].astype(jnp.float32) * w_ref[l]
    o_ref[...] = acc.astype(o_ref.dtype)


def weighted_layer_sum(hiddens, weights):
    """hiddens: (L, B, S, D), weights: (L,) -> (B, S, D).  Row-tiled axpy."""
    L, B, S, D = hiddens.shape
    N = B * S
    h2 = hiddens.reshape(L, N, D)
    tm = N if N <= TROW else TROW
    Np = _ceil_to(N, tm)
    if Np != N:
        h2 = jnp.pad(h2, ((0, 0), (0, Np - N), (0, 0)))
    out = pl.pallas_call(
        _wsum_kernel,
        out_shape=jax.ShapeDtypeStruct((Np, D), hiddens.dtype),
        grid=(Np // tm,),
        in_specs=[pl.BlockSpec((L, 1, 1), lambda i: (0, 0, 0)),
                  pl.BlockSpec((L, tm, D), lambda i: (0, i, 0))],
        out_specs=pl.BlockSpec((tm, D), lambda i: (i, 0)),
        compiler_params=pltpu.CompilerParams(
            dimension_semantics=("parallel",),
            vmem_limit_bytes=VMEM_LIMIT_BYTES),
    )(weights.reshape(L, 1, 1), h2)
    return out[:N].reshape(B, S, D)


# ----------------------- FeedbackPosition (T5 bias) -------------------------

def _relative_position_bucket(rel_pos, num_buckets=32, max_distance=128):
    # causal variant (matches the reference RelativePositionBias).
    n = np.maximum(-rel_pos, 0)
    max_exact = num_buckets // 2
    is_small = n < max_exact
    n_safe = np.maximum(n, 1)
    val_if_large = max_exact + (
        np.log(n_safe / max_exact) / np.log(max_distance / max_exact)
        * (num_buckets - max_exact)
    ).astype(np.int32)
    val_if_large = np.minimum(val_if_large, num_buckets - 1)
    return np.where(is_small, n, val_if_large).astype(np.int32)


def feedback_position_bias(emb_table, q_len, k_len):
    """emb_table: (num_buckets, H) -> bias (H, q_len, k_len).
    q_pos and k_pos both start at 0 (rel = k_pos - q_pos), exactly as the
    reference FeedbackPosition/RelativePositionBias computes it."""
    q_pos = np.arange(q_len)
    k_pos = np.arange(k_len)
    rel = k_pos[None, :] - q_pos[:, None]
    buckets = _relative_position_bucket(rel)          # host-side glue
    bias = emb_table[jnp.asarray(buckets)]            # (q_len, k_len, H)
    return jnp.transpose(bias, (2, 0, 1))


# --------------------------- Feedback forward -------------------------------

def feedback_layer(x, mem_k, mem_v, bias_mem, bias_self, lp, n_head, d_head):
    hd = n_head * d_head
    # LN1 + fused q/kv projection (q scale folded into w_qkv at prep time).
    qkv = linear(x, lp['w_qkv'], ln=(lp['ln1_g'], lp['ln1_b']))
    q = qkv[..., :hd]
    self_k = qkv[..., hd:2 * hd]
    self_v = qkv[..., 2 * hd:]

    a = attention(q, self_k, self_v, mem_k, mem_v, bias_mem, bias_self,
                  n_head, d_head)
    x = linear(a, lp['w_o'], lp['b_o'], residual=x)        # fused residual

    # MLP: LN2 fused into ff1 (+GELU), residual fused into ff2.
    h = linear(x, lp['w_ff1'], lp['b_ff1'], activation=_gelu,
               ln=(lp['ln2_g'], lp['ln2_b']))
    return linear(h, lp['w_ff2'], lp['b_ff2'], residual=x)


def feedback_segment(params, x_seg, memory, layer_weight, bias, cfg):
    mem_k, mem_v = memory
    M = mem_k.shape[1]
    bias_mem = bias[:, :, :M]
    bias_self = bias[:, :, M:]

    h = x_seg
    hiddens = [h]
    for lp in params['layers']:
        h = feedback_layer(h, mem_k, mem_v, bias_mem, bias_self, lp,
                           cfg['n_head'], cfg['d_head'])
        hiddens.append(h)
    hiddens = jnp.stack(hiddens, axis=0)                     # (L+1, B, S, D)

    agg = weighted_layer_sum(hiddens, layer_weight)          # (B, S, D)

    mkv = linear(agg, params['w_shared_kv'])
    new_k, new_v = jnp.split(mkv, 2, axis=-1)
    mem_k = jnp.concatenate([mem_k, new_k], axis=1)[:, -cfg['mem_len']:]
    mem_v = jnp.concatenate([mem_v, new_v], axis=1)[:, -cfg['mem_len']:]
    return h, (mem_k, mem_v)


def feedback_forward(params, x, memory, cfg):
    """x: (B, L, D); memory: (mem_k, mem_v) each (B, mem_len, H*dh)."""
    outputs = []
    L = x.shape[1]
    M = memory[0].shape[1]
    layer_weight = jax.nn.softmax(params['layer_weight'])    # (L+1,), hoisted
    bias_cache = {}                                          # per segment len
    for start in range(0, L, cfg['tgt_len']):
        seg = x[:, start:start + cfg['tgt_len']]
        S = seg.shape[1]
        if S not in bias_cache:
            bias_cache[S] = feedback_position_bias(params['pos_emb'], S, M + S)
        out, memory = feedback_segment(params, seg, memory, layer_weight,
                                       bias_cache[S], cfg)
        outputs.append(out)
    return jnp.concatenate(outputs, axis=1), memory


# ---------------------------- parameter init --------------------------------

def init_params(key, n_layer, d_model, n_head, d_head, d_inner, num_buckets=32):
    std = 0.02
    keys = jax.random.split(key, 2 + n_layer)
    params = {
        'pos_emb': std * jax.random.normal(keys[0], (num_buckets, n_head),
                                           jnp.float32),
        'w_shared_kv': std * jax.random.normal(
            keys[1], (d_model, 2 * n_head * d_head), jnp.float32),
        'layer_weight': jnp.ones((n_layer + 1,), jnp.float32),
        'layers': [],
    }
    for i in range(n_layer):
        k = jax.random.split(keys[2 + i], 4)
        params['layers'].append(dict(
            ln1_g=jnp.ones((d_model,), jnp.float32),
            ln1_b=jnp.zeros((d_model,), jnp.float32),
            w_q=std * jax.random.normal(k[0], (d_model, n_head * d_head),
                                        jnp.float32),
            w_o=std * jax.random.normal(k[1], (n_head * d_head, d_model),
                                        jnp.float32),
            b_o=jnp.zeros((d_model,), jnp.float32),
            ln2_g=jnp.ones((d_model,), jnp.float32),
            ln2_b=jnp.zeros((d_model,), jnp.float32),
            w_ff1=std * jax.random.normal(k[2], (d_model, d_inner), jnp.float32),
            b_ff1=jnp.zeros((d_inner,), jnp.float32),
            w_ff2=std * jax.random.normal(k[3], (d_inner, d_model), jnp.float32),
            b_ff2=jnp.zeros((d_model,), jnp.float32),
        ))
    return params


def prepare_params(params, cfg):
    """One-time prep: fold q scale into w_q, fuse q/kv projection weights into
    a single matmul, and cast matmul weights to bf16 (f32 accumulation stays
    inside the kernels)."""
    scale = cfg['d_head'] ** -0.5
    prepped = {
        'pos_emb': params['pos_emb'],
        'layer_weight': params['layer_weight'],
        'w_shared_kv': params['w_shared_kv'].astype(jnp.bfloat16),
        'layers': [],
    }
    for lp in params['layers']:
        w_qkv = jnp.concatenate([lp['w_q'] * scale, params['w_shared_kv']],
                                axis=1)
        prepped['layers'].append(dict(
            ln1_g=lp['ln1_g'], ln1_b=lp['ln1_b'],
            ln2_g=lp['ln2_g'], ln2_b=lp['ln2_b'],
            w_qkv=w_qkv.astype(jnp.bfloat16),
            w_o=lp['w_o'].astype(jnp.bfloat16), b_o=lp['b_o'],
            w_ff1=lp['w_ff1'].astype(jnp.bfloat16), b_ff1=lp['b_ff1'],
            w_ff2=lp['w_ff2'].astype(jnp.bfloat16), b_ff2=lp['b_ff2'],
        ))
    return prepped


# --------------------------------- main --------------------------------------

if __name__ == "__main__":
    # TODO(synk): dropout (drop_out / drop_att) is eval-mode identity here.
    cfg = dict(n_layer=2, d_model=32, n_head=2, d_head=16, d_inner=64,
               tgt_len=8, mem_len=16)
    B, total_len = 2, 16   # two segments of tgt_len=8

    key = jax.random.PRNGKey(0)
    kx, kmk, kmv, kp = jax.random.split(key, 4)
    raw_params = init_params(kp, cfg['n_layer'], cfg['d_model'], cfg['n_head'],
                             cfg['d_head'], cfg['d_inner'])
    params = prepare_params(raw_params, cfg)

    x = jax.random.normal(kx, (B, total_len, cfg['d_model']), jnp.float32)
    mem_k = jax.random.normal(
        kmk, (B, cfg['mem_len'], cfg['n_head'] * cfg['d_head']), jnp.float32)
    mem_v = jax.random.normal(
        kmv, (B, cfg['mem_len'], cfg['n_head'] * cfg['d_head']), jnp.float32)

    fwd = jax.jit(lambda p, xx, mem: feedback_forward(p, xx, mem, cfg))
    out, (new_k, new_v) = fwd(params, x, (mem_k, mem_v))
    jax.block_until_ready((out, new_k, new_v))

    assert out.shape == (B, total_len, cfg['d_model'])
    assert new_k.shape == mem_k.shape and new_v.shape == mem_v.shape
    assert bool(jnp.all(jnp.isfinite(out)))
    assert bool(jnp.all(jnp.isfinite(new_k))) and bool(jnp.all(jnp.isfinite(new_v)))
    print("KERNEL_OK")
</pallas_src>

<mosaic_0001>
module attributes {stable_mosaic.version = 11 : i64} {
  func.func @_linear_kernel(%arg0: i32, %arg1: i32, %arg2: i32, %arg3: memref<16x32xf32, #tpu.memory_space<vmem>>, %arg4: memref<32x96xbf16, #tpu.memory_space<vmem>>, %arg5: memref<1x32xf32, #tpu.memory_space<vmem>>, %arg6: memref<1x32xf32, #tpu.memory_space<vmem>>, %arg7: memref<16x96xf32, #tpu.memory_space<vmem>>) attributes {dimension_semantics = [#tpu.dimension_semantics<parallel>, #tpu.dimension_semantics<parallel>, #tpu.dimension_semantics<arbitrary>], iteration_bounds = array<i64: 1, 1, 1>, scalar_prefetch = 0 : i64, scratch_operands = 0 : i64, tpu.core_type = #tpu.core_type<tc>, window_params = [{transform_indices = @transform_0, window_bounds = array<i64: 16, 32>}, {transform_indices = @transform_1, window_bounds = array<i64: 32, 96>}, {pipeline_mode = #tpu.pipeline_mode<synchronous>, transform_indices = @transform_2, window_bounds = array<i64: 1, 32>}, {pipeline_mode = #tpu.pipeline_mode<synchronous>, transform_indices = @transform_3, window_bounds = array<i64: 1, 32>}, {transform_indices = @transform_4, window_bounds = array<i64: 16, 96>}]} {
    %c0 = arith.constant 0 : index
    %c0_0 = arith.constant 0 : index
    %0 = vector.load %arg3[%c0, %c0_0] : memref<16x32xf32, #tpu.memory_space<vmem>>, vector<16x32xf32>
    %cst = arith.constant dense<0.000000e+00> : vector<16xf32>
    %1 = vector.multi_reduction <add>, %0, %cst [1] : vector<16x32xf32> to vector<16xf32>
    %2 = vector.shape_cast %1 : vector<16xf32> to vector<16x1xf32>
    %cst_1 = arith.constant 3.200000e+01 : f32
    %3 = vector.broadcast %cst_1 : f32 to vector<16x1xf32>
    %4 = arith.divf %2, %3 : vector<16x1xf32>
    %5 = vector.broadcast %4 : vector<16x1xf32> to vector<16x32xf32>
    %6 = arith.subf %0, %5 : vector<16x32xf32>
    %7 = arith.mulf %6, %6 : vector<16x32xf32>
    %cst_2 = arith.constant dense<0.000000e+00> : vector<16xf32>
    %8 = vector.multi_reduction <add>, %7, %cst_2 [1] : vector<16x32xf32> to vector<16xf32>
    %9 = vector.shape_cast %8 : vector<16xf32> to vector<16x1xf32>
    %cst_3 = arith.constant 3.200000e+01 : f32
    %10 = vector.broadcast %cst_3 : f32 to vector<16x1xf32>
    %11 = arith.divf %9, %10 : vector<16x1xf32>
    %12 = vector.broadcast %4 : vector<16x1xf32> to vector<16x32xf32>
    %13 = arith.subf %0, %12 : vector<16x32xf32>
    %cst_4 = arith.constant 9.99999974E-6 : f32
    %14 = vector.broadcast %cst_4 : f32 to vector<16x1xf32>
    %15 = arith.addf %11, %14 : vector<16x1xf32>
    %16 = math.rsqrt %15 : vector<16x1xf32>
    %17 = vector.broadcast %16 : vector<16x1xf32> to vector<16x32xf32>
    %18 = arith.mulf %13, %17 : vector<16x32xf32>
    %c0_5 = arith.constant 0 : index
    %c0_6 = arith.constant 0 : index
    %19 = vector.load %arg5[%c0_5, %c0_6] : memref<1x32xf32, #tpu.memory_space<vmem>>, vector<1x32xf32>
    %20 = vector.broadcast %19 : vector<1x32xf32> to vector<16x32xf32>
    %21 = arith.mulf %18, %20 : vector<16x32xf32>
    %c0_7 = arith.constant 0 : index
    %c0_8 = arith.constant 0 : index
    %22 = vector.load %arg6[%c0_7, %c0_8] : memref<1x32xf32, #tpu.memory_space<vmem>>, vector<1x32xf32>
    %23 = vector.broadcast %22 : vector<1x32xf32> to vector<16x32xf32>
    %24 = arith.addf %21, %23 : vector<16x32xf32>
    %25 = arith.truncf %24 : vector<16x32xf32> to vector<16x32xbf16>
    %c0_9 = arith.constant 0 : index
    %c0_10 = arith.constant 0 : index
    %26 = vector.load %arg4[%c0_9, %c0_10] : memref<32x96xbf16, #tpu.memory_space<vmem>>, vector<32x96xbf16>
    %cst_11 = arith.constant dense<0.000000e+00> : vector<16x96xf32>
    %27 = tpu.matmul %25, %26, %cst_11 {dimension_numbers = #tpu.dot_dimension_numbers<[1], [0], [0], [1], [0, 0, 1, 1], [], []>} : vector<16x32xbf16>, vector<32x96xbf16>, vector<16x96xf32> -> vector<16x96xf32>
    %c0_12 = arith.constant 0 : index
    %c0_13 = arith.constant 0 : index
    %28 = vector.load %arg7[%c0_12, %c0_13] : memref<16x96xf32, #tpu.memory_space<vmem>>, vector<16x96xf32>
    tpu.vector_store %arg7[%c0_12, %c0_13], %27 {strides = array<i32>} : memref<16x96xf32, #tpu.memory_space<vmem>>, vector<16x96xf32>,
    return
  }
  func.func @transform_0(%arg0: i32, %arg1: i32, %arg2: i32) -> (i32, i32) {
    %c0_i32 = arith.constant 0 : i32
    return %arg0, %arg2 : i32, i32
  }
  func.func @transform_1(%arg0: i32, %arg1: i32, %arg2: i32) -> (i32, i32) {
    %c0_i32 = arith.constant 0 : i32
    return %arg2, %arg1 : i32, i32
  }
  func.func @transform_2(%arg0: i32, %arg1: i32, %arg2: i32) -> (i32, i32) {
    %c0_i32 = arith.constant 0 : i32
    %c0_i32_0 = arith.constant 0 : i32
    %c0_i32_1 = arith.constant 0 : i32
    return %c0_i32, %c0_i32_0 : i32, i32
  }
  func.func @transform_3(%arg0: i32, %arg1: i32, %arg2: i32) -> (i32, i32) {
    %c0_i32 = arith.constant 0 : i32
    %c0_i32_0 = arith.constant 0 : i32
    %c0_i32_1 = arith.constant 0 : i32
    return %c0_i32, %c0_i32_0 : i32, i32
  }
  func.func @transform_4(%arg0: i32, %arg1: i32, %arg2: i32) -> (i32, i32) {
    %c0_i32 = arith.constant 0 : i32
    return %arg0, %arg1 : i32, i32
  }
}

module attributes {stable_mosaic.version = 11 : i64} {
  func.func @_linear_kernel(%arg0: i32, %arg1: i32, %arg2: i32, %arg3: memref<16x32xf32, #tpu.memory_space<vmem>>, %arg4: memref<32x64xbf16, #tpu.memory_space<vmem>>, %arg5: memref<1x64xf32, #tpu.memory_space<vmem>>, %arg6: memref<1x32xf32, #tpu.memory_space<vmem>>, %arg7: memref<1x32xf32, #tpu.memory_space<vmem>>, %arg8: memref<16x64xf32, #tpu.memory_space<vmem>>) attributes {dimension_semantics = [#tpu.dimension_semantics<parallel>, #tpu.dimension_semantics<parallel>, #tpu.dimension_semantics<arbitrary>], iteration_bounds = array<i64: 1, 1, 1>, scalar_prefetch = 0 : i64, scratch_operands = 0 : i64, tpu.core_type = #tpu.core_type<tc>, window_params = [{transform_indices = @transform_0, window_bounds = array<i64: 16, 32>}, {transform_indices = @transform_1, window_bounds = array<i64: 32, 64>}, {transform_indices = @transform_2, window_bounds = array<i64: 1, 64>}, {pipeline_mode = #tpu.pipeline_mode<synchronous>, transform_indices = @transform_3, window_bounds = array<i64: 1, 32>}, {pipeline_mode = #tpu.pipeline_mode<synchronous>, transform_indices = @transform_4, window_bounds = array<i64: 1, 32>}, {transform_indices = @transform_5, window_bounds = array<i64: 16, 64>}]} {
    %c0 = arith.constant 0 : index
    %c0_0 = arith.constant 0 : index
    %0 = vector.load %arg3[%c0, %c0_0] : memref<16x32xf32, #tpu.memory_space<vmem>>, vector<16x32xf32>
    %cst = arith.constant dense<0.000000e+00> : vector<16xf32>
    %1 = vector.multi_reduction <add>, %0, %cst [1] : vector<16x32xf32> to vector<16xf32>
    %2 = vector.shape_cast %1 : vector<16xf32> to vector<16x1xf32>
    %cst_1 = arith.constant 3.200000e+01 : f32
    %3 = vector.broadcast %cst_1 : f32 to vector<16x1xf32>
    %4 = arith.divf %2, %3 : vector<16x1xf32>
    %5 = vector.broadcast %4 : vector<16x1xf32> to vector<16x32xf32>
    %6 = arith.subf %0, %5 : vector<16x32xf32>
    %7 = arith.mulf %6, %6 : vector<16x32xf32>
    %cst_2 = arith.constant dense<0.000000e+00> : vector<16xf32>
    %8 = vector.multi_reduction <add>, %7, %cst_2 [1] : vector<16x32xf32> to vector<16xf32>
    %9 = vector.shape_cast %8 : vector<16xf32> to vector<16x1xf32>
    %cst_3 = arith.constant 3.200000e+01 : f32
    %10 = vector.broadcast %cst_3 : f32 to vector<16x1xf32>
    %11 = arith.divf %9, %10 : vector<16x1xf32>
    %12 = vector.broadcast %4 : vector<16x1xf32> to vector<16x32xf32>
    %13 = arith.subf %0, %12 : vector<16x32xf32>
    %cst_4 = arith.constant 9.99999974E-6 : f32
    %14 = vector.broadcast %cst_4 : f32 to vector<16x1xf32>
    %15 = arith.addf %11, %14 : vector<16x1xf32>
    %16 = math.rsqrt %15 : vector<16x1xf32>
    %17 = vector.broadcast %16 : vector<16x1xf32> to vector<16x32xf32>
    %18 = arith.mulf %13, %17 : vector<16x32xf32>
    %c0_5 = arith.constant 0 : index
    %c0_6 = arith.constant 0 : index
    %19 = vector.load %arg6[%c0_5, %c0_6] : memref<1x32xf32, #tpu.memory_space<vmem>>, vector<1x32xf32>
    %20 = vector.broadcast %19 : vector<1x32xf32> to vector<16x32xf32>
    %21 = arith.mulf %18, %20 : vector<16x32xf32>
    %c0_7 = arith.constant 0 : index
    %c0_8 = arith.constant 0 : index
    %22 = vector.load %arg7[%c0_7, %c0_8] : memref<1x32xf32, #tpu.memory_space<vmem>>, vector<1x32xf32>
    %23 = vector.broadcast %22 : vector<1x32xf32> to vector<16x32xf32>
    %24 = arith.addf %21, %23 : vector<16x32xf32>
    %25 = arith.truncf %24 : vector<16x32xf32> to vector<16x32xbf16>
    %c0_9 = arith.constant 0 : index
    %c0_10 = arith.constant 0 : index
    %26 = vector.load %arg4[%c0_9, %c0_10] : memref<32x64xbf16, #tpu.memory_space<vmem>>, vector<32x64xbf16>
    %cst_11 = arith.constant dense<0.000000e+00> : vector<16x64xf32>
    %27 = tpu.matmul %25, %26, %cst_11 {dimension_numbers = #tpu.dot_dimension_numbers<[1], [0], [0], [1], [0, 0, 1, 1], [], []>} : vector<16x32xbf16>, vector<32x64xbf16>, vector<16x64xf32> -> vector<16x64xf32>
    %c0_12 = arith.constant 0 : index
    %c0_13 = arith.constant 0 : index
    %28 = vector.load %arg5[%c0_12, %c0_13] : memref<1x64xf32, #tpu.memory_space<vmem>>, vector<1x64xf32>
    %29 = vector.broadcast %28 : vector<1x64xf32> to vector<16x64xf32>
    %30 = arith.addf %27, %29 : vector<16x64xf32>
    %31 = arith.mulf %30, %30 : vector<16x64xf32>
    %32 = arith.mulf %30, %31 : vector<16x64xf32>
    %cst_14 = arith.constant 4.471500e-02 : f32
    %33 = vector.broadcast %cst_14 : f32 to vector<16x64xf32>
    %34 = arith.mulf %33, %32 : vector<16x64xf32>
    %35 = arith.addf %30, %34 : vector<16x64xf32>
    %cst_15 = arith.constant 0.797884583 : f32
    %36 = vector.broadcast %cst_15 : f32 to vector<16x64xf32>
    %37 = arith.mulf %36, %35 : vector<16x64xf32>
    %38 = math.tanh %37 : vector<16x64xf32>
    %cst_16 = arith.constant 1.000000e+00 : f32
    %39 = vector.broadcast %cst_16 : f32 to vector<16x64xf32>
    %40 = arith.addf %39, %38 : vector<16x64xf32>
    %cst_17 = arith.constant 5.000000e-01 : f32
    %41 = vector.broadcast %cst_17 : f32 to vector<16x64xf32>
    %42 = arith.mulf %41, %40 : vector<16x64xf32>
    %43 = arith.mulf %30, %42 : vector<16x64xf32>
    %c0_18 = arith.constant 0 : index
    %c0_19 = arith.constant 0 : index
    %44 = vector.load %arg8[%c0_18, %c0_19] : memref<16x64xf32, #tpu.memory_space<vmem>>, vector<16x64xf32>
    tpu.vector_store %arg8[%c0_18, %c0_19], %43 {strides = array<i32>} : memref<16x64xf32, #tpu.memory_space<vmem>>, vector<16x64xf32>,
    return
  }
  func.func @transform_0(%arg0: i32, %arg1: i32, %arg2: i32) -> (i32, i32) {
    %c0_i32 = arith.constant 0 : i32
    return %arg0, %arg2 : i32, i32
  }
  func.func @transform_1(%arg0: i32, %arg1: i32, %arg2: i32) -> (i32, i32) {
    %c0_i32 = arith.constant 0 : i32
    return %arg2, %arg1 : i32, i32
  }
  func.func @transform_2(%arg0: i32, %arg1: i32, %arg2: i32) -> (i32, i32) {
    %c0_i32 = arith.constant 0 : i32
    %c0_i32_0 = arith.constant 0 : i32
    return %c0_i32, %arg1 : i32, i32
  }
  func.func @transform_3(%arg0: i32, %arg1: i32, %arg2: i32) -> (i32, i32) {
    %c0_i32 = arith.constant 0 : i32
    %c0_i32_0 = arith.constant 0 : i32
    %c0_i32_1 = arith.constant 0 : i32
    return %c0_i32, %c0_i32_0 : i32, i32
  }
  func.func @transform_4(%arg0: i32, %arg1: i32, %arg2: i32) -> (i32, i32) {
    %c0_i32 = arith.constant 0 : i32
    %c0_i32_0 = arith.constant 0 : i32
    %c0_i32_1 = arith.constant 0 : i32
    return %c0_i32, %c0_i32_0 : i32, i32
  }
  func.func @transform_5(%arg0: i32, %arg1: i32, %arg2: i32) -> (i32, i32) {
    %c0_i32 = arith.constant 0 : i32
    return %arg0, %arg1 : i32, i32
  }
}

module attributes {stable_mosaic.version = 11 : i64} {
  func.func @_linear_kernel(%arg0: i32, %arg1: i32, %arg2: i32, %arg3: memref<16x32xf32, #tpu.memory_space<vmem>>, %arg4: memref<32x32xbf16, #tpu.memory_space<vmem>>, %arg5: memref<1x32xf32, #tpu.memory_space<vmem>>, %arg6: memref<16x32xf32, #tpu.memory_space<vmem>>, %arg7: memref<16x32xf32, #tpu.memory_space<vmem>>) attributes {dimension_semantics = [#tpu.dimension_semantics<parallel>, #tpu.dimension_semantics<parallel>, #tpu.dimension_semantics<arbitrary>], iteration_bounds = array<i64: 1, 1, 1>, scalar_prefetch = 0 : i64, scratch_operands = 0 : i64, tpu.core_type = #tpu.core_type<tc>, window_params = [{transform_indices = @transform_0, window_bounds = array<i64: 16, 32>}, {transform_indices = @transform_1, window_bounds = array<i64: 32, 32>}, {transform_indices = @transform_2, window_bounds = array<i64: 1, 32>}, {transform_indices = @transform_3, window_bounds = array<i64: 16, 32>}, {transform_indices = @transform_4, window_bounds = array<i64: 16, 32>}]} {
    %c0 = arith.constant 0 : index
    %c0_0 = arith.constant 0 : index
    %0 = vector.load %arg3[%c0, %c0_0] : memref<16x32xf32, #tpu.memory_space<vmem>>, vector<16x32xf32>
    %1 = arith.truncf %0 : vector<16x32xf32> to vector<16x32xbf16>
    %c0_1 = arith.constant 0 : index
    %c0_2 = arith.constant 0 : index
    %2 = vector.load %arg4[%c0_1, %c0_2] : memref<32x32xbf16, #tpu.memory_space<vmem>>, vector<32x32xbf16>
    %cst = arith.constant dense<0.000000e+00> : vector<16x32xf32>
    %3 = tpu.matmul %1, %2, %cst {dimension_numbers = #tpu.dot_dimension_numbers<[1], [0], [0], [1], [0, 0, 1, 1], [], []>} : vector<16x32xbf16>, vector<32x32xbf16>, vector<16x32xf32> -> vector<16x32xf32>
    %c0_3 = arith.constant 0 : index
    %c0_4 = arith.constant 0 : index
    %4 = vector.load %arg5[%c0_3, %c0_4] : memref<1x32xf32, #tpu.memory_space<vmem>>, vector<1x32xf32>
    %5 = vector.broadcast %4 : vector<1x32xf32> to vector<16x32xf32>
    %6 = arith.addf %3, %5 : vector<16x32xf32>
    %c0_5 = arith.constant 0 : index
    %c0_6 = arith.constant 0 : index
    %7 = vector.load %arg6[%c0_5, %c0_6] : memref<16x32xf32, #tpu.memory_space<vmem>>, vector<16x32xf32>
    %8 = arith.addf %6, %7 : vector<16x32xf32>
    %c0_7 = arith.constant 0 : index
    %c0_8 = arith.constant 0 : index
    %9 = vector.load %arg7[%c0_7, %c0_8] : memref<16x32xf32, #tpu.memory_space<vmem>>, vector<16x32xf32>
    tpu.vector_store %arg7[%c0_7, %c0_8], %8 {strides = array<i32>} : memref<16x32xf32, #tpu.memory_space<vmem>>, vector<16x32xf32>,
    return
  }
  func.func @transform_0(%arg0: i32, %arg1: i32, %arg2: i32) -> (i32, i32) {
    %c0_i32 = arith.constant 0 : i32
    return %arg0, %arg2 : i32, i32
  }
  func.func @transform_1(%arg0: i32, %arg1: i32, %arg2: i32) -> (i32, i32) {
    %c0_i32 = arith.constant 0 : i32
    return %arg2, %arg1 : i32, i32
  }
  func.func @transform_2(%arg0: i32, %arg1: i32, %arg2: i32) -> (i32, i32) {
    %c0_i32 = arith.constant 0 : i32
    %c0_i32_0 = arith.constant 0 : i32
    return %c0_i32, %arg1 : i32, i32
  }
  func.func @transform_3(%arg0: i32, %arg1: i32, %arg2: i32) -> (i32, i32) {
    %c0_i32 = arith.constant 0 : i32
    return %arg0, %arg1 : i32, i32
  }
  func.func @transform_4(%arg0: i32, %arg1: i32, %arg2: i32) -> (i32, i32) {
    %c0_i32 = arith.constant 0 : i32
    return %arg0, %arg1 : i32, i32
  }
}

module attributes {stable_mosaic.version = 11 : i64} {
  func.func @_attention_kernel(%arg0: i32, %arg1: memref<1x8x32xf32, #tpu.memory_space<vmem>>, %arg2: memref<1x8x32xf32, #tpu.memory_space<vmem>>, %arg3: memref<1x8x32xf32, #tpu.memory_space<vmem>>, %arg4: memref<1x16x32xf32, #tpu.memory_space<vmem>>, %arg5: memref<1x16x32xf32, #tpu.memory_space<vmem>>, %arg6: memref<2x8x16xf32, #tpu.memory_space<vmem>>, %arg7: memref<2x8x8xf32, #tpu.memory_space<vmem>>, %arg8: memref<1x8x32xf32, #tpu.memory_space<vmem>>) attributes {dimension_semantics = [#tpu.dimension_semantics<parallel>], iteration_bounds = array<i64: 2>, scalar_prefetch = 0 : i64, scratch_operands = 0 : i64, tpu.core_type = #tpu.core_type<tc>, window_params = [{transform_indices = @transform_0, window_bounds = array<i64: 1, 8, 32>}, {transform_indices = @transform_1, window_bounds = array<i64: 1, 8, 32>}, {transform_indices = @transform_2, window_bounds = array<i64: 1, 8, 32>}, {transform_indices = @transform_3, window_bounds = array<i64: 1, 16, 32>}, {transform_indices = @transform_4, window_bounds = array<i64: 1, 16, 32>}, {pipeline_mode = #tpu.pipeline_mode<synchronous>, transform_indices = @transform_5, window_bounds = array<i64: 2, 8, 16>}, {pipeline_mode = #tpu.pipeline_mode<synchronous>, transform_indices = @transform_6, window_bounds = array<i64: 2, 8, 8>}, {transform_indices = @transform_7, window_bounds = array<i64: 1, 8, 32>}]} {
    %c0 = arith.constant 0 : index
    %c0_0 = arith.constant 0 : index
    %c0_1 = arith.constant 0 : index
    %0 = vector.load %arg1[%c0, %c0_0, %c0_1] : memref<1x8x32xf32, #tpu.memory_space<vmem>>, vector<1x8x32xf32>
    %1 = vector.shape_cast %0 : vector<1x8x32xf32> to vector<8x32xf32>
    %c0_2 = arith.constant 0 : index
    %c0_3 = arith.constant 0 : index
    %c0_4 = arith.constant 0 : index
    %2 = vector.load %arg2[%c0_2, %c0_3, %c0_4] : memref<1x8x32xf32, #tpu.memory_space<vmem>>, vector<1x8x32xf32>
    %3 = vector.shape_cast %2 : vector<1x8x32xf32> to vector<8x32xf32>
    %c0_5 = arith.constant 0 : index
    %c0_6 = arith.constant 0 : index
    %c0_7 = arith.constant 0 : index
    %4 = vector.load %arg3[%c0_5, %c0_6, %c0_7] : memref<1x8x32xf32, #tpu.memory_space<vmem>>, vector<1x8x32xf32>
    %5 = vector.shape_cast %4 : vector<1x8x32xf32> to vector<8x32xf32>
    %c0_8 = arith.constant 0 : index
    %c0_9 = arith.constant 0 : index
    %c0_10 = arith.constant 0 : index
    %6 = vector.load %arg4[%c0_8, %c0_9, %c0_10] : memref<1x16x32xf32, #tpu.memory_space<vmem>>, vector<1x16x32xf32>
    %7 = vector.shape_cast %6 : vector<1x16x32xf32> to vector<16x32xf32>
    %c0_11 = arith.constant 0 : index
    %c0_12 = arith.constant 0 : index
    %c0_13 = arith.constant 0 : index
    %8 = vector.load %arg5[%c0_11, %c0_12, %c0_13] : memref<1x16x32xf32, #tpu.memory_space<vmem>>, vector<1x16x32xf32>
    %9 = vector.shape_cast %8 : vector<1x16x32xf32> to vector<16x32xf32>
    %10 = vector.extract_strided_slice %1 {offsets = [0, 0], sizes = [8, 16], strides = [1, 1]} : vector<8x32xf32> to vector<8x16xf32>
    %11 = arith.truncf %10 : vector<8x16xf32> to vector<8x16xbf16>
    %12 = vector.extract_strided_slice %3 {offsets = [0, 0], sizes = [8, 16], strides = [1, 1]} : vector<8x32xf32> to vector<8x16xf32>
    %13 = arith.truncf %12 : vector<8x16xf32> to vector<8x16xbf16>
    %14 = vector.extract_strided_slice %5 {offsets = [0, 0], sizes = [8, 16], strides = [1, 1]} : vector<8x32xf32> to vector<8x16xf32>
    %15 = arith.truncf %14 : vector<8x16xf32> to vector<8x16xbf16>
    %16 = vector.extract_strided_slice %7 {offsets = [0, 0], sizes = [16, 16], strides = [1, 1]} : vector<16x32xf32> to vector<16x16xf32>
    %17 = arith.truncf %16 : vector<16x16xf32> to vector<16x16xbf16>
    %18 = vector.extract_strided_slice %9 {offsets = [0, 0], sizes = [16, 16], strides = [1, 1]} : vector<16x32xf32> to vector<16x16xf32>
    %19 = arith.truncf %18 : vector<16x16xf32> to vector<16x16xbf16>
    %cst = arith.constant dense<0.000000e+00> : vector<8x16xf32>
    %20 = tpu.matmul %11, %17, %cst {dimension_numbers = #tpu.dot_dimension_numbers<[1], [1], [0], [0], [0, 0, 1, 0], [], []>} : vector<8x16xbf16>, vector<16x16xbf16>, vector<8x16xf32> -> vector<8x16xf32>
    %c0_14 = arith.constant 0 : index
    %c0_15 = arith.constant 0 : index
    %c0_16 = arith.constant 0 : index
    %21 = vector.load %arg6[%c0_14, %c0_15, %c0_16] : memref<2x8x16xf32, #tpu.memory_space<vmem>>, vector<1x8x16xf32>
    %22 = vector.shape_cast %21 : vector<1x8x16xf32> to vector<8x16xf32>
    %23 = arith.addf %20, %22 : vector<8x16xf32>
    %cst_17 = arith.constant dense<0.000000e+00> : vector<8x8xf32>
    %24 = tpu.matmul %11, %13, %cst_17 {dimension_numbers = #tpu.dot_dimension_numbers<[1], [1], [0], [0], [0, 0, 1, 0], [], []>} : vector<8x16xbf16>, vector<8x16xbf16>, vector<8x8xf32> -> vector<8x8xf32>
    %c0_18 = arith.constant 0 : index
    %c0_19 = arith.constant 0 : index
    %c0_20 = arith.constant 0 : index
    %25 = vector.load %arg7[%c0_18, %c0_19, %c0_20] : memref<2x8x8xf32, #tpu.memory_space<vmem>>, vector<1x8x8xf32>
    %26 = vector.shape_cast %25 : vector<1x8x8xf32> to vector<8x8xf32>
    %27 = arith.addf %24, %26 : vector<8x8xf32>
    %cst_21 = arith.constant dense<0xFF800000> : vector<8xf32>
    %28 = vector.multi_reduction <maximumf>, %23, %cst_21 [1] : vector<8x16xf32> to vector<8xf32>
    %29 = vector.shape_cast %28 : vector<8xf32> to vector<8x1xf32>
    %cst_22 = arith.constant dense<0xFF800000> : vector<8xf32>
    %30 = vector.multi_reduction <maximumf>, %27, %cst_22 [1] : vector<8x8xf32> to vector<8xf32>
    %31 = vector.shape_cast %30 : vector<8xf32> to vector<8x1xf32>
    %32 = arith.maximumf %29, %31 : vector<8x1xf32>
    %33 = vector.broadcast %32 : vector<8x1xf32> to vector<8x16xf32>
    %34 = arith.subf %23, %33 : vector<8x16xf32>
    %35 = math.exp %34 : vector<8x16xf32>
    %36 = vector.broadcast %32 : vector<8x1xf32> to vector<8x8xf32>
    %37 = arith.subf %27, %36 : vector<8x8xf32>
    %38 = math.exp %37 : vector<8x8xf32>
    %cst_23 = arith.constant dense<0.000000e+00> : vector<8xf32>
    %39 = vector.multi_reduction <add>, %35, %cst_23 [1] : vector<8x16xf32> to vector<8xf32>
    %40 = vector.shape_cast %39 : vector<8xf32> to vector<8x1xf32>
    %cst_24 = arith.constant dense<0.000000e+00> : vector<8xf32>
    %41 = vector.multi_reduction <add>, %38, %cst_24 [1] : vector<8x8xf32> to vector<8xf32>
    %42 = vector.shape_cast %41 : vector<8xf32> to vector<8x1xf32>
    %43 = arith.addf %40, %42 : vector<8x1xf32>
    %44 = arith.truncf %35 : vector<8x16xf32> to vector<8x16xbf16>
    %cst_25 = arith.constant dense<0.000000e+00> : vector<8x16xf32>
    %45 = tpu.matmul %44, %19, %cst_25 {dimension_numbers = #tpu.dot_dimension_numbers<[1], [0], [0], [1], [0, 0, 1, 1], [], []>} : vector<8x16xbf16>, vector<16x16xbf16>, vector<8x16xf32> -> vector<8x16xf32>
    %46 = arith.truncf %38 : vector<8x8xf32> to vector<8x8xbf16>
    %cst_26 = arith.constant dense<0.000000e+00> : vector<8x16xf32>
    %47 = tpu.matmul %46, %15, %cst_26 {dimension_numbers = #tpu.dot_dimension_numbers<[1], [0], [0], [1], [0, 0, 1, 1], [], []>} : vector<8x8xbf16>, vector<8x16xbf16>, vector<8x16xf32> -> vector<8x16xf32>
    %48 = arith.addf %45, %47 : vector<8x16xf32>
    %49 = tpu.reciprocal %43 {approx = true} : vector<8x1xf32> -> vector<8x1xf32>
    %50 = vector.broadcast %49 : vector<8x1xf32> to vector<8x16xf32>
    %51 = arith.mulf %48, %50 : vector<8x16xf32>
    %52 = vector.extract_strided_slice %1 {offsets = [0, 16], sizes = [8, 16], strides = [1, 1]} : vector<8x32xf32> to vector<8x16xf32>
    %53 = arith.truncf %52 : vector<8x16xf32> to vector<8x16xbf16>
    %54 = vector.extract_strided_slice %3 {offsets = [0, 16], sizes = [8, 16], strides = [1, 1]} : vector<8x32xf32> to vector<8x16xf32>
    %55 = arith.truncf %54 : vector<8x16xf32> to vector<8x16xbf16>
    %56 = vector.extract_strided_slice %5 {offsets = [0, 16], sizes = [8, 16], strides = [1, 1]} : vector<8x32xf32> to vector<8x16xf32>
    %57 = arith.truncf %56 : vector<8x16xf32> to vector<8x16xbf16>
    %58 = vector.extract_strided_slice %7 {offsets = [0, 16], sizes = [16, 16], strides = [1, 1]} : vector<16x32xf32> to vector<16x16xf32>
    %59 = arith.truncf %58 : vector<16x16xf32> to vector<16x16xbf16>
    %60 = vector.extract_strided_slice %9 {offsets = [0, 16], sizes = [16, 16], strides = [1, 1]} : vector<16x32xf32> to vector<16x16xf32>
    %61 = arith.truncf %60 : vector<16x16xf32> to vector<16x16xbf16>
    %cst_27 = arith.constant dense<0.000000e+00> : vector<8x16xf32>
    %62 = tpu.matmul %53, %59, %cst_27 {dimension_numbers = #tpu.dot_dimension_numbers<[1], [1], [0], [0], [0, 0, 1, 0], [], []>} : vector<8x16xbf16>, vector<16x16xbf16>, vector<8x16xf32> -> vector<8x16xf32>
    %c1 = arith.constant 1 : index
    %c0_28 = arith.constant 0 : index
    %c0_29 = arith.constant 0 : index
    %63 = vector.load %arg6[%c1, %c0_28, %c0_29] : memref<2x8x16xf32, #tpu.memory_space<vmem>>, vector<1x8x16xf32>
    %64 = vector.shape_cast %63 : vector<1x8x16xf32> to vector<8x16xf32>
    %65 = arith.addf %62, %64 : vector<8x16xf32>
    %cst_30 = arith.constant dense<0.000000e+00> : vector<8x8xf32>
    %66 = tpu.matmul %53, %55, %cst_30 {dimension_numbers = #tpu.dot_dimension_numbers<[1], [1], [0], [0], [0, 0, 1, 0], [], []>} : vector<8x16xbf16>, vector<8x16xbf16>, vector<8x8xf32> -> vector<8x8xf32>
    %c1_31 = arith.constant 1 : index
    %c0_32 = arith.constant 0 : index
    %c0_33 = arith.constant 0 : index
    %67 = vector.load %arg7[%c1_31, %c0_32, %c0_33] : memref<2x8x8xf32, #tpu.memory_space<vmem>>, vector<1x8x8xf32>
    %68 = vector.shape_cast %67 : vector<1x8x8xf32> to vector<8x8xf32>
    %69 = arith.addf %66, %68 : vector<8x8xf32>
    %cst_34 = arith.constant dense<0xFF800000> : vector<8xf32>
    %70 = vector.multi_reduction <maximumf>, %65, %cst_34 [1] : vector<8x16xf32> to vector<8xf32>
    %71 = vector.shape_cast %70 : vector<8xf32> to vector<8x1xf32>
    %cst_35 = arith.constant dense<0xFF800000> : vector<8xf32>
    %72 = vector.multi_reduction <maximumf>, %69, %cst_35 [1] : vector<8x8xf32> to vector<8xf32>
    %73 = vector.shape_cast %72 : vector<8xf32> to vector<8x1xf32>
    %74 = arith.maximumf %71, %73 : vector<8x1xf32>
    %75 = vector.broadcast %74 : vector<8x1xf32> to vector<8x16xf32>
    %76 = arith.subf %65, %75 : vector<8x16xf32>
    %77 = math.exp %76 : vector<8x16xf32>
    %78 = vector.broadcast %74 : vector<8x1xf32> to vector<8x8xf32>
    %79 = arith.subf %69, %78 : vector<8x8xf32>
    %80 = math.exp %79 : vector<8x8xf32>
    %cst_36 = arith.constant dense<0.000000e+00> : vector<8xf32>
    %81 = vector.multi_reduction <add>, %77, %cst_36 [1] : vector<8x16xf32> to vector<8xf32>
    %82 = vector.shape_cast %81 : vector<8xf32> to vector<8x1xf32>
    %cst_37 = arith.constant dense<0.000000e+00> : vector<8xf32>
    %83 = vector.multi_reduction <add>, %80, %cst_37 [1] : vector<8x8xf32> to vector<8xf32>
    %84 = vector.shape_cast %83 : vector<8xf32> to vector<8x1xf32>
    %85 = arith.addf %82, %84 : vector<8x1xf32>
    %86 = arith.truncf %77 : vector<8x16xf32> to vector<8x16xbf16>
    %cst_38 = arith.constant dense<0.000000e+00> : vector<8x16xf32>
    %87 = tpu.matmul %86, %61, %cst_38 {dimension_numbers = #tpu.dot_dimension_numbers<[1], [0], [0], [1], [0, 0, 1, 1], [], []>} : vector<8x16xbf16>, vector<16x16xbf16>, vector<8x16xf32> -> vector<8x16xf32>
    %88 = arith.truncf %80 : vector<8x8xf32> to vector<8x8xbf16>
    %cst_39 = arith.constant dense<0.000000e+00> : vector<8x16xf32>
    %89 = tpu.matmul %88, %57, %cst_39 {dimension_numbers = #tpu.dot_dimension_numbers<[1], [0], [0], [1], [0, 0, 1, 1], [], []>} : vector<8x8xbf16>, vector<8x16xbf16>, vector<8x16xf32> -> vector<8x16xf32>
    %90 = arith.addf %87, %89 : vector<8x16xf32>
    %91 = tpu.reciprocal %85 {approx = true} : vector<8x1xf32> -> vector<8x1xf32>
    %92 = vector.broadcast %91 : vector<8x1xf32> to vector<8x16xf32>
    %93 = arith.mulf %90, %92 : vector<8x16xf32>
    %94 = tpu.concatenate %51, %93 in 1 : vector<8x16xf32>, vector<8x16xf32> -> vector<8x32xf32>
    %c0_40 = arith.constant 0 : index
    %c0_41 = arith.constant 0 : index
    %c0_42 = arith.constant 0 : index
    %95 = vector.load %arg8[%c0_40, %c0_41, %c0_42] : memref<1x8x32xf32, #tpu.memory_space<vmem>>, vector<1x8x32xf32>
    %96 = vector.shape_cast %95 : vector<1x8x32xf32> to vector<8x32xf32>
    %97 = vector.shape_cast %94 : vector<8x32xf32> to vector<1x8x32xf32>
    tpu.vector_store %arg8[%c0_40, %c0_41, %c0_42], %97 {strides = array<i32>} : memref<1x8x32xf32, #tpu.memory_space<vmem>>, vector<1x8x32xf32>,
    return
  }
  func.func @transform_0(%arg0: i32) -> (i32, i32, i32) {
    %c0_i32 = arith.constant 0 : i32
    %c0_i32_0 = arith.constant 0 : i32
    %c0_i32_1 = arith.constant 0 : i32
    return %arg0, %c0_i32, %c0_i32_0 : i32, i32, i32
  }
  func.func @transform_1(%arg0: i32) -> (i32, i32, i32) {
    %c0_i32 = arith.constant 0 : i32
    %c0_i32_0 = arith.constant 0 : i32
    %c0_i32_1 = arith.constant 0 : i32
    return %arg0, %c0_i32, %c0_i32_0 : i32, i32, i32
  }
  func.func @transform_2(%arg0: i32) -> (i32, i32, i32) {
    %c0_i32 = arith.constant 0 : i32
    %c0_i32_0 = arith.constant 0 : i32
    %c0_i32_1 = arith.constant 0 : i32
    return %arg0, %c0_i32, %c0_i32_0 : i32, i32, i32
  }
  func.func @transform_3(%arg0: i32) -> (i32, i32, i32) {
    %c0_i32 = arith.constant 0 : i32
    %c0_i32_0 = arith.constant 0 : i32
    %c0_i32_1 = arith.constant 0 : i32
    return %arg0, %c0_i32, %c0_i32_0 : i32, i32, i32
  }
  func.func @transform_4(%arg0: i32) -> (i32, i32, i32) {
    %c0_i32 = arith.constant 0 : i32
    %c0_i32_0 = arith.constant 0 : i32
    %c0_i32_1 = arith.constant 0 : i32
    return %arg0, %c0_i32, %c0_i32_0 : i32, i32, i32
  }
  func.func @transform_5(%arg0: i32) -> (i32, i32, i32) {
    %c0_i32 = arith.constant 0 : i32
    %c0_i32_0 = arith.constant 0 : i32
    %c0_i32_1 = arith.constant 0 : i32
    %c0_i32_2 = arith.constant 0 : i32
    return %c0_i32, %c0_i32_0, %c0_i32_1 : i32, i32, i32
  }
  func.func @transform_6(%arg0: i32) -> (i32, i32, i32) {
    %c0_i32 = arith.constant 0 : i32
    %c0_i32_0 = arith.constant 0 : i32
    %c0_i32_1 = arith.constant 0 : i32
    %c0_i32_2 = arith.constant 0 : i32
    return %c0_i32, %c0_i32_0, %c0_i32_1 : i32, i32, i32
  }
  func.func @transform_7(%arg0: i32) -> (i32, i32, i32) {
    %c0_i32 = arith.constant 0 : i32
    %c0_i32_0 = arith.constant 0 : i32
    %c0_i32_1 = arith.constant 0 : i32
    return %arg0, %c0_i32, %c0_i32_0 : i32, i32, i32
  }
}

module attributes {stable_mosaic.version = 11 : i64} {
  func.func @_linear_kernel(%arg0: i32, %arg1: i32, %arg2: i32, %arg3: memref<16x64xf32, #tpu.memory_space<vmem>>, %arg4: memref<64x32xbf16, #tpu.memory_space<vmem>>, %arg5: memref<1x32xf32, #tpu.memory_space<vmem>>, %arg6: memref<16x32xf32, #tpu.memory_space<vmem>>, %arg7: memref<16x32xf32, #tpu.memory_space<vmem>>) attributes {dimension_semantics = [#tpu.dimension_semantics<parallel>, #tpu.dimension_semantics<parallel>, #tpu.dimension_semantics<arbitrary>], iteration_bounds = array<i64: 1, 1, 1>, scalar_prefetch = 0 : i64, scratch_operands = 0 : i64, tpu.core_type = #tpu.core_type<tc>, window_params = [{transform_indices = @transform_0, window_bounds = array<i64: 16, 64>}, {transform_indices = @transform_1, window_bounds = array<i64: 64, 32>}, {transform_indices = @transform_2, window_bounds = array<i64: 1, 32>}, {transform_indices = @transform_3, window_bounds = array<i64: 16, 32>}, {transform_indices = @transform_4, window_bounds = array<i64: 16, 32>}]} {
    %c0 = arith.constant 0 : index
    %c0_0 = arith.constant 0 : index
    %0 = vector.load %arg3[%c0, %c0_0] : memref<16x64xf32, #tpu.memory_space<vmem>>, vector<16x64xf32>
    %1 = arith.truncf %0 : vector<16x64xf32> to vector<16x64xbf16>
    %c0_1 = arith.constant 0 : index
    %c0_2 = arith.constant 0 : index
    %2 = vector.load %arg4[%c0_1, %c0_2] : memref<64x32xbf16, #tpu.memory_space<vmem>>, vector<64x32xbf16>
    %cst = arith.constant dense<0.000000e+00> : vector<16x32xf32>
    %3 = tpu.matmul %1, %2, %cst {dimension_numbers = #tpu.dot_dimension_numbers<[1], [0], [0], [1], [0, 0, 1, 1], [], []>} : vector<16x64xbf16>, vector<64x32xbf16>, vector<16x32xf32> -> vector<16x32xf32>
    %c0_3 = arith.constant 0 : index
    %c0_4 = arith.constant 0 : index
    %4 = vector.load %arg5[%c0_3, %c0_4] : memref<1x32xf32, #tpu.memory_space<vmem>>, vector<1x32xf32>
    %5 = vector.broadcast %4 : vector<1x32xf32> to vector<16x32xf32>
    %6 = arith.addf %3, %5 : vector<16x32xf32>
    %c0_5 = arith.constant 0 : index
    %c0_6 = arith.constant 0 : index
    %7 = vector.load %arg6[%c0_5, %c0_6] : memref<16x32xf32, #tpu.memory_space<vmem>>, vector<16x32xf32>
    %8 = arith.addf %6, %7 : vector<16x32xf32>
    %c0_7 = arith.constant 0 : index
    %c0_8 = arith.constant 0 : index
    %9 = vector.load %arg7[%c0_7, %c0_8] : memref<16x32xf32, #tpu.memory_space<vmem>>, vector<16x32xf32>
    tpu.vector_store %arg7[%c0_7, %c0_8], %8 {strides = array<i32>} : memref<16x32xf32, #tpu.memory_space<vmem>>, vector<16x32xf32>,
    return
  }
  func.func @transform_0(%arg0: i32, %arg1: i32, %arg2: i32) -> (i32, i32) {
    %c0_i32 = arith.constant 0 : i32
    return %arg0, %arg2 : i32, i32
  }
  func.func @transform_1(%arg0: i32, %arg1: i32, %arg2: i32) -> (i32, i32) {
    %c0_i32 = arith.constant 0 : i32
    return %arg2, %arg1 : i32, i32
  }
  func.func @transform_2(%arg0: i32, %arg1: i32, %arg2: i32) -> (i32, i32) {
    %c0_i32 = arith.constant 0 : i32
    %c0_i32_0 = arith.constant 0 : i32
    return %c0_i32, %arg1 : i32, i32
  }
  func.func @transform_3(%arg0: i32, %arg1: i32, %arg2: i32) -> (i32, i32) {
    %c0_i32 = arith.constant 0 : i32
    return %arg0, %arg1 : i32, i32
  }
  func.func @transform_4(%arg0: i32, %arg1: i32, %arg2: i32) -> (i32, i32) {
    %c0_i32 = arith.constant 0 : i32
    return %arg0, %arg1 : i32, i32
  }
}

module attributes {stable_mosaic.version = 11 : i64} {
  func.func @_wsum_kernel(%arg0: i32, %arg1: memref<3x1x1xf32, #tpu.memory_space<vmem>>, %arg2: memref<3x16x32xf32, #tpu.memory_space<vmem>>, %arg3: memref<16x32xf32, #tpu.memory_space<vmem>>) attributes {dimension_semantics = [#tpu.dimension_semantics<parallel>], iteration_bounds = array<i64: 1>, scalar_prefetch = 0 : i64, scratch_operands = 0 : i64, tpu.core_type = #tpu.core_type<tc>, window_params = [{pipeline_mode = #tpu.pipeline_mode<synchronous>, transform_indices = @transform_0, window_bounds = array<i64: 3, 1, 1>}, {transform_indices = @transform_1, window_bounds = array<i64: 3, 16, 32>}, {transform_indices = @transform_2, window_bounds = array<i64: 16, 32>}]} {
    %c0 = arith.constant 0 : index
    %c0_0 = arith.constant 0 : index
    %c0_1 = arith.constant 0 : index
    %0 = vector.load %arg2[%c0, %c0_0, %c0_1] : memref<3x16x32xf32, #tpu.memory_space<vmem>>, vector<1x16x32xf32>
    %1 = vector.shape_cast %0 : vector<1x16x32xf32> to vector<16x32xf32>
    %c0_2 = arith.constant 0 : index
    %c0_3 = arith.constant 0 : index
    %c0_4 = arith.constant 0 : index
    %2 = vector.load %arg1[%c0_2, %c0_3, %c0_4] : memref<3x1x1xf32, #tpu.memory_space<vmem>>, vector<1x1x1xf32>
    %3 = vector.shape_cast %2 : vector<1x1x1xf32> to vector<1x1xf32>
    %4 = vector.broadcast %3 : vector<1x1xf32> to vector<16x32xf32>
    %5 = arith.mulf %1, %4 : vector<16x32xf32>
    %c1 = arith.constant 1 : index
    %c0_5 = arith.constant 0 : index
    %c0_6 = arith.constant 0 : index
    %6 = vector.load %arg2[%c1, %c0_5, %c0_6] : memref<3x16x32xf32, #tpu.memory_space<vmem>>, vector<1x16x32xf32>
    %7 = vector.shape_cast %6 : vector<1x16x32xf32> to vector<16x32xf32>
    %c1_7 = arith.constant 1 : index
    %c0_8 = arith.constant 0 : index
    %c0_9 = arith.constant 0 : index
    %8 = vector.load %arg1[%c1_7, %c0_8, %c0_9] : memref<3x1x1xf32, #tpu.memory_space<vmem>>, vector<1x1x1xf32>
    %9 = vector.shape_cast %8 : vector<1x1x1xf32> to vector<1x1xf32>
    %10 = vector.broadcast %9 : vector<1x1xf32> to vector<16x32xf32>
    %11 = arith.mulf %7, %10 : vector<16x32xf32>
    %12 = arith.addf %5, %11 : vector<16x32xf32>
    %c2 = arith.constant 2 : index
    %c0_10 = arith.constant 0 : index
    %c0_11 = arith.constant 0 : index
    %13 = vector.load %arg2[%c2, %c0_10, %c0_11] : memref<3x16x32xf32, #tpu.memory_space<vmem>>, vector<1x16x32xf32>
    %14 = vector.shape_cast %13 : vector<1x16x32xf32> to vector<16x32xf32>
    %c2_12 = arith.constant 2 : index
    %c0_13 = arith.constant 0 : index
    %c0_14 = arith.constant 0 : index
    %15 = vector.load %arg1[%c2_12, %c0_13, %c0_14] : memref<3x1x1xf32, #tpu.memory_space<vmem>>, vector<1x1x1xf32>
    %16 = vector.shape_cast %15 : vector<1x1x1xf32> to vector<1x1xf32>
    %17 = vector.broadcast %16 : vector<1x1xf32> to vector<16x32xf32>
    %18 = arith.mulf %14, %17 : vector<16x32xf32>
    %19 = arith.addf %12, %18 : vector<16x32xf32>
    %c0_15 = arith.constant 0 : index
    %c0_16 = arith.constant 0 : index
    %20 = vector.load %arg3[%c0_15, %c0_16] : memref<16x32xf32, #tpu.memory_space<vmem>>, vector<16x32xf32>
    tpu.vector_store %arg3[%c0_15, %c0_16], %19 {strides = array<i32>} : memref<16x32xf32, #tpu.memory_space<vmem>>, vector<16x32xf32>,
    return
  }
  func.func @transform_0(%arg0: i32) -> (i32, i32, i32) {
    %c0_i32 = arith.constant 0 : i32
    %c0_i32_0 = arith.constant 0 : i32
    %c0_i32_1 = arith.constant 0 : i32
    %c0_i32_2 = arith.constant 0 : i32
    return %c0_i32, %c0_i32_0, %c0_i32_1 : i32, i32, i32
  }
  func.func @transform_1(%arg0: i32) -> (i32, i32, i32) {
    %c0_i32 = arith.constant 0 : i32
    %c0_i32_0 = arith.constant 0 : i32
    %c0_i32_1 = arith.constant 0 : i32
    return %c0_i32, %arg0, %c0_i32_0 : i32, i32, i32
  }
  func.func @transform_2(%arg0: i32) -> (i32, i32) {
    %c0_i32 = arith.constant 0 : i32
    %c0_i32_0 = arith.constant 0 : i32
    return %arg0, %c0_i32 : i32, i32
  }
}

module attributes {stable_mosaic.version = 11 : i64} {
  func.func @_linear_kernel(%arg0: i32, %arg1: i32, %arg2: i32, %arg3: memref<16x32xf32, #tpu.memory_space<vmem>>, %arg4: memref<32x64xbf16, #tpu.memory_space<vmem>>, %arg5: memref<16x64xf32, #tpu.memory_space<vmem>>) attributes {dimension_semantics = [#tpu.dimension_semantics<parallel>, #tpu.dimension_semantics<parallel>, #tpu.dimension_semantics<arbitrary>], iteration_bounds = array<i64: 1, 1, 1>, scalar_prefetch = 0 : i64, scratch_operands = 0 : i64, tpu.core_type = #tpu.core_type<tc>, window_params = [{transform_indices = @transform_0, window_bounds = array<i64: 16, 32>}, {transform_indices = @transform_1, window_bounds = array<i64: 32, 64>}, {transform_indices = @transform_2, window_bounds = array<i64: 16, 64>}]} {
    %c0 = arith.constant 0 : index
    %c0_0 = arith.constant 0 : index
    %0 = vector.load %arg3[%c0, %c0_0] : memref<16x32xf32, #tpu.memory_space<vmem>>, vector<16x32xf32>
    %1 = arith.truncf %0 : vector<16x32xf32> to vector<16x32xbf16>
    %c0_1 = arith.constant 0 : index
    %c0_2 = arith.constant 0 : index
    %2 = vector.load %arg4[%c0_1, %c0_2] : memref<32x64xbf16, #tpu.memory_space<vmem>>, vector<32x64xbf16>
    %cst = arith.constant dense<0.000000e+00> : vector<16x64xf32>
    %3 = tpu.matmul %1, %2, %cst {dimension_numbers = #tpu.dot_dimension_numbers<[1], [0], [0], [1], [0, 0, 1, 1], [], []>} : vector<16x32xbf16>, vector<32x64xbf16>, vector<16x64xf32> -> vector<16x64xf32>
    %c0_3 = arith.constant 0 : index
    %c0_4 = arith.constant 0 : index
    %4 = vector.load %arg5[%c0_3, %c0_4] : memref<16x64xf32, #tpu.memory_space<vmem>>, vector<16x64xf32>
    tpu.vector_store %arg5[%c0_3, %c0_4], %3 {strides = array<i32>} : memref<16x64xf32, #tpu.memory_space<vmem>>, vector<16x64xf32>,
    return
  }
  func.func @transform_0(%arg0: i32, %arg1: i32, %arg2: i32) -> (i32, i32) {
    %c0_i32 = arith.constant 0 : i32
    return %arg0, %arg2 : i32, i32
  }
  func.func @transform_1(%arg0: i32, %arg1: i32, %arg2: i32) -> (i32, i32) {
    %c0_i32 = arith.constant 0 : i32
    return %arg2, %arg1 : i32, i32
  }
  func.func @transform_2(%arg0: i32, %arg1: i32, %arg2: i32) -> (i32, i32) {
    %c0_i32 = arith.constant 0 : i32
    return %arg0, %arg1 : i32, i32
  }
}

</mosaic_0001>

<bundles_post_ra>
// kernel: _lambda_.26
= control target key start
LH: loop header
LB: loop body
LE: loop exit
PB: predicated region body
PF: predicated region fallthrough
CT: control target
= control target key end

     0   :  { %vm41_vm0 = vcmask 261120   ;;  %s133_s1 = inlined_call_operand.vmem [shape: bf16[32,32], index: 1, kind: input, shape index: {}]   ;;  %s134_s0 = inlined_call_operand.vmem [shape: f32[16,32], index: 0, kind: input, shape index: {}]   ;;  %s135_s2 = inlined_call_operand.vmem [shape: f32[1,32], index: 2, kind: input, shape index: {}]   ;;  %s136_s3 = inlined_call_operand.vmem [shape: f32[16,32], index: 3, kind: input, shape index: {}]   ;;  %s137_s4 = inlined_call_operand.vmem [shape: f32[16,32], index: 4, kind: output, shape index: {}]  }
   0x1   :  { %v79_v0 = vld [vmem:[%s133_s1 + $0x8] sm:$0xff]  ;;  %v78_v1 = vld [vmem:[%s133_s1] sm:$0xff] }
   0x2   :  { %51 = vmatpush.bf16.msra.mxu0 %v79_v0  ;;  %v18_v2 = vld [vmem:[%s134_s0] sm:$0xff]  ;;  %v19_v3 = vld [vmem:[%s134_s0 + $0x8] sm:$0xff] }
   0x3   :  { %v20_v4 = vpack.c.bf16 %v19_v3, %v18_v2  ;;  %v80_v5 = vld [vmem:[%s135_s2] ss:$0 sm:$0xff]  ;;  %v60_v11 = vld [vmem:[%s136_s3 + $0x8] sm:$0xff] }
   0x4   :  { %v59_v7 = vld [vmem:[%s136_s3] sm:$0xff] }
   0x6   :  { %52 = vmatpush.bf16.msra.mxu0 %v78_v1 }
   0x9   :  { %77 = vmatmul.msk.bf16.vlgmr.msra.gmra.mxu0 %vm41_vm0, %v20_v4 }
  0x86   :  { %v54_v6 = vpop.f32.mrf.mxu0 }
  0x87   :  { %v55_v8 = vadd.f32 %v80_v5, %v54_v6 }
  0x89   :  { %v61_v9 = vadd.f32 %v59_v7, %v55_v8 }
  0x8b   :  { %63 = vst.msk [vmem:[%s137_s4] sm:$0xff] %vm41_vm0, %v61_v9 }
  0x8e   :  { %v56_v10 = vpop.f32.mrf.mxu0 }
  0x8f   :  { %v57_v12 = vadd.f32 %v80_v5, %v56_v10 }
  0x91   :  { %v62_v13 = vadd.f32 %v60_v11, %v57_v12 }
  0x93   :  { %64 = vst.msk [vmem:[%s137_s4 + $0x8] sm:$0xff] %vm41_vm0, %v62_v13 }

// kernel: _lambda_.27
= control target key start
LH: loop header
LB: loop body
LE: loop exit
PB: predicated region body
PF: predicated region fallthrough
CT: control target
= control target key end

     0   :  { %vm23_vm0 = vcmask 261120   ;;  %v175_v4 = vmov 32.0   ;;  %vm143_vm8 = vcmask 523264   ;;  %s238_s0 = inlined_call_operand.vmem [shape: f32[16,32], index: 0, kind: input, shape index: {}]   ;;  %s239_s3 = inlined_call_operand.vmem [shape: f32[1,32], index: 3, kind: input, shape index: {}]   ;;  %s240_s4 = inlined_call_operand.vmem [shape: f32[1,32], index: 4, kind: input, shape index: {}]   ;;  %s241_s2 = inlined_call_operand.vmem [shape: f32[1,64], index: 2, kind: input, shape index: {}]   ;;  %s242_s1 = inlined_call_operand.vmem [shape: bf16[32,64], index: 1, kind: input, shape index: {}]   ;;  %s243_s5 = inlined_call_operand.vmem [shape: f32[16,64], index: 5, kind: output, shape index: {}]  }
   0x1   :  { %v21_v0 = vld [vmem:[%s238_s0] sm:$0xff]  ;;  %v22_v2 = vld [vmem:[%s238_s0 + $0x8] sm:$0xff]  ;;  %165 = vrcp.f32 %v175_v4 }
   0x2   :  { %v24_v1 = vsel %vm23_vm0, %v21_v0, 0.0  ;;  %v27_v3 = vsel %vm23_vm0, %v22_v2, 0.0  ;;  %v160_v21 = vld [vmem:[%s242_s1 + $0x8] sm:$0xff]  ;;  %v159_v23 = vld [vmem:[%s242_s1] sm:$0xff] }
   0x3   :  { %25 = vadd.xlane.f32.xlu0 %v24_v1  ;;  %117 = vmatpush.bf16.msra.mxu0 %v160_v21  ;;  %v162_v42 = vld [vmem:[%s239_s3] ss:$0 sm:$0xff] }
   0x4   :  { %v163_v47 = vld [vmem:[%s240_s4] ss:$0 sm:$0xff] }
   0x5   :  { %v164_v52 = vld [vmem:[%s241_s2] ss:$0 sm:$0xff] }
   0x7   :  { %v166_v5 = vpop.eup %165  ;;  %118 = vmatpush.bf16.msra.mxu0 %v159_v23 }
   0x8   :  { %v31_v6 = vmul.f32 32.0, %v166_v5  ;;  %vm35_vm1 = vweird.f32 %v166_v5 }
   0xa   :  { %v32_v7 = vsub.f32 1.0, %v31_v6 }
   0xb   :  { %28 = vadd.xlane.f32.xlu0 %v27_v3 }
   0xc   :  { %v33_v8 = vmul.f32 %v166_v5, %v32_v7 }
   0xe   :  { %v34_v9 = vadd.f32 %v166_v5, %v33_v8 }
  0x10   :  { %v36_v10 = vsel %vm35_vm1, %v166_v5, %v34_v9 }
  0x76   :  { %v26_v11 = vpop.xlane.xlu0 %25 }
  0x77   :  { %v37_v12 = vmul.f32 %v36_v10, %v26_v11 }
  0x79   :  { %v39_v13 = vsub.f32 %v21_v0, %v37_v12 }
  0x7b   :  { %v41_v14 = vmul.f32 %v39_v13, %v39_v13 }
  0x7d   :  { %v43_v15 = vsel %vm23_vm0, %v41_v14, 0.0 }
  0x7e   :  { %44 = vadd.xlane.f32.xlu1 %v43_v15  ;;  %v29_v16 = vpop.xlane.xlu0 %28 }
  0x7f   :  { %v38_v17 = vmul.f32 %v36_v10, %v29_v16 }
  0x81   :  { %v40_v18 = vsub.f32 %v22_v2, %v38_v17 }
  0x83   :  { %v42_v19 = vmul.f32 %v40_v18, %v40_v18 }
  0x85   :  { %v46_v20 = vsel %vm23_vm0, %v42_v19, 0.0 }
  0x86   :  { %47 = vadd.xlane.f32.xlu1 %v46_v20 }
  0xf1   :  { %v45_v22 = vpop.xlane.xlu1 %44 }
  0xf2   :  { %v49_v24 = vmul.f32 %v45_v22, %v36_v10 }
  0xf4   :  { %v51_v25 = vadd.f32 1e-05, %v49_v24 }
  0xf6   :  { %167 = vrsqrt.f32 %v51_v25  ;;  %vm59_vm3 = vweird.f32 %v51_v25 }
  0xf9   :  { %v48_v26 = vpop.xlane.xlu1 %47 }
  0xfa   :  { %v50_v27 = vmul.f32 %v48_v26, %v36_v10 }
  0xfc   :  { %v168_v28 = vpop.eup %167  ;;  %v52_v29 = vadd.f32 1e-05, %v50_v27 }
  0xfd   :  { %v54_v30 = vmul.f32 %v168_v28, %v51_v25  ;;  %vm60_vm2 = vweird.f32 %v168_v28 }
  0xfe   :  { %169 = vrsqrt.f32 %v52_v29  ;;  %vm61_vm4 = vmor %vm59_vm3, %vm60_vm2  ;;  %vm69_vm6 = vweird.f32 %v52_v29 }
  0xff   :  { %v55_v31 = vmul.f32 %v168_v28, %v54_v30 }
 0x101   :  { %v56_v32 = vmul.f32 0.5, %v55_v31 }
 0x103   :  { %v57_v33 = vsub.f32 1.5, %v56_v32 }
 0x104   :  { %v170_v34 = vpop.eup %169 }
 0x105   :  { %v58_v35 = vmul.f32 %v168_v28, %v57_v33  ;;  %v64_v36 = vmul.f32 %v170_v34, %v52_v29  ;;  %vm70_vm5 = vweird.f32 %v170_v34 }
 0x106   :  { %vm71_vm7 = vmor %vm69_vm6, %vm70_vm5 }
 0x107   :  { %v65_v37 = vmul.f32 %v170_v34, %v64_v36  ;;  %v62_v38 = vsel %vm61_vm4, %v168_v28, %v58_v35 }
 0x108   :  { %v73_v41 = vmul.f32 %v62_v38, %v39_v13 }
 0x109   :  { %v66_v39 = vmul.f32 0.5, %v65_v37 }
 0x10a   :  { %v79_v46 = vmul.f32 %v162_v42, %v73_v41 }
 0x10b   :  { %v67_v40 = vsub.f32 1.5, %v66_v39 }
 0x10c   :  { %v85_v49 = vadd.f32 %v163_v47, %v79_v46 }
 0x10d   :  { %v68_v43 = vmul.f32 %v170_v34, %v67_v40 }
 0x10f   :  { %v72_v44 = vsel %vm71_vm7, %v170_v34, %v68_v43 }
 0x110   :  { %v74_v45 = vmul.f32 %v72_v44, %v40_v18 }
 0x112   :  { %v80_v48 = vmul.f32 %v162_v42, %v74_v45 }
 0x114   :  { %v86_v50 = vadd.f32 %v163_v47, %v80_v48 }
 0x116   :  { %v87_v51 = vpack.c.bf16 %v86_v50, %v85_v49 }
 0x118   :  { %158 = vmatmul.msk.bf16.vlgmr.msra.gmra.mxu0 %vm23_vm0, %v87_v51 }
 0x195   :  { %v120_v53 = vpop.f32.mrf.mxu0 }
 0x196   :  { %v121_v54 = vadd.f32 %v164_v52, %v120_v53 }
 0x198   :  { %v125_v55 = vmul.f32 %v121_v54, %v121_v54 }
 0x19a   :  { %v127_v56 = vmul.f32 %v125_v55, %v121_v54 }
 0x19c   :  { %v129_v57 = vmul.f32 0.044715, %v127_v56 }
 0x19d   :  { %v122_v58 = vpop.f32.mrf.mxu0 }
 0x19e   :  { %v131_v59 = vadd.f32 %v129_v57, %v121_v54  ;;  %v123_v60 = vadd.f32 %v164_v52, %v122_v58 }
 0x1a0   :  { %v133_v61 = vmul.f32 0.7978846, %v131_v59  ;;  %v126_v62 = vmul.f32 %v123_v60, %v123_v60 }
 0x1a2   :  { %171 = vtanh.f32 %v133_v61  ;;  %v128_v63 = vmul.f32 %v126_v62, %v123_v60 }
 0x1a4   :  { %v130_v0 = vmul.f32 0.044715, %v128_v63 }
 0x1a6   :  { %v132_v1 = vadd.f32 %v130_v0, %v123_v60 }
 0x1a8   :  { %v172_v2 = vpop.eup %171  ;;  %v134_v3 = vmul.f32 0.7978846, %v132_v1 }
 0x1a9   :  { %v137_v4 = vadd.f32 1.0, %v172_v2 }
 0x1aa   :  { %173 = vtanh.f32 %v134_v3 }
 0x1ab   :  { %v139_v5 = vmul.f32 0.5, %v137_v4 }
 0x1ad   :  { %v141_v6 = vmul.f32 %v139_v5, %v121_v54 }
 0x1af   :  { %144 = vst.msk [vmem:[%s243_s5] sm:$0xff] %vm143_vm8, %v141_v6 }
 0x1b0   :  { %v174_v7 = vpop.eup %173 }
 0x1b1   :  { %v138_v8 = vadd.f32 1.0, %v174_v7 }
 0x1b3   :  { %v140_v9 = vmul.f32 0.5, %v138_v8 }
 0x1b5   :  { %v142_v10 = vmul.f32 %v140_v9, %v123_v60 }
 0x1b7   :  { %145 = vst.msk [vmem:[%s243_s5 + $0x8] sm:$0xff] %vm143_vm8, %v142_v10 }

// kernel: _lambda_.24
= control target key start
LH: loop header
LB: loop body
LE: loop exit
PB: predicated region body
PF: predicated region fallthrough
CT: control target
= control target key end

     0   :  { %vm20_vm0 = vcmask 261120   ;;  %v145_v4 = vmov 32.0   ;;  %vm118_vm8 = vcmask 785408   ;;  %s200_s0 = inlined_call_operand.vmem [shape: f32[16,32], index: 0, kind: input, shape index: {}]   ;;  %s201_s2 = inlined_call_operand.vmem [shape: f32[1,32], index: 2, kind: input, shape index: {}]   ;;  %s202_s3 = inlined_call_operand.vmem [shape: f32[1,32], index: 3, kind: input, shape index: {}]   ;;  %s203_s1 = inlined_call_operand.vmem [shape: bf16[32,96], index: 1, kind: input, shape index: {}]   ;;  %s204_s4 = inlined_call_operand.vmem [shape: f32[16,96], index: 4, kind: output, shape index: {}]  }
   0x1   :  { %v18_v0 = vld [vmem:[%s200_s0] sm:$0xff]  ;;  %v19_v2 = vld [vmem:[%s200_s0 + $0x8] sm:$0xff]  ;;  %139 = vrcp.f32 %v145_v4 }
   0x2   :  { %v21_v1 = vsel %vm20_vm0, %v18_v0, 0.0  ;;  %v24_v3 = vsel %vm20_vm0, %v19_v2, 0.0  ;;  %v135_v21 = vld [vmem:[%s203_s1 + $0x8] sm:$0xff]  ;;  %v134_v23 = vld [vmem:[%s203_s1] sm:$0xff] }
   0x3   :  { %22 = vadd.xlane.f32.xlu0 %v21_v1  ;;  %110 = vmatpush.bf16.msra.mxu0 %v135_v21  ;;  %v137_v42 = vld [vmem:[%s201_s2] ss:$0 sm:$0xff] }
   0x4   :  { %v138_v47 = vld [vmem:[%s202_s3] ss:$0 sm:$0xff] }
   0x7   :  { %v140_v5 = vpop.eup %139  ;;  %111 = vmatpush.bf16.msra.mxu0 %v134_v23 }
   0x8   :  { %v28_v6 = vmul.f32 32.0, %v140_v5  ;;  %vm32_vm1 = vweird.f32 %v140_v5 }
   0xa   :  { %v29_v7 = vsub.f32 1.0, %v28_v6 }
   0xb   :  { %25 = vadd.xlane.f32.xlu0 %v24_v3 }
   0xc   :  { %v30_v8 = vmul.f32 %v140_v5, %v29_v7 }
   0xe   :  { %v31_v9 = vadd.f32 %v140_v5, %v30_v8 }
  0x10   :  { %v33_v10 = vsel %vm32_vm1, %v140_v5, %v31_v9 }
  0x76   :  { %v23_v11 = vpop.xlane.xlu0 %22 }
  0x77   :  { %v34_v12 = vmul.f32 %v33_v10, %v23_v11 }
  0x79   :  { %v36_v13 = vsub.f32 %v18_v0, %v34_v12 }
  0x7b   :  { %v38_v14 = vmul.f32 %v36_v13, %v36_v13 }
  0x7d   :  { %v40_v15 = vsel %vm20_vm0, %v38_v14, 0.0 }
  0x7e   :  { %41 = vadd.xlane.f32.xlu1 %v40_v15  ;;  %v26_v16 = vpop.xlane.xlu0 %25 }
  0x7f   :  { %v35_v17 = vmul.f32 %v33_v10, %v26_v16 }
  0x81   :  { %v37_v18 = vsub.f32 %v19_v2, %v35_v17 }
  0x83   :  { %v39_v19 = vmul.f32 %v37_v18, %v37_v18 }
  0x85   :  { %v43_v20 = vsel %vm20_vm0, %v39_v19, 0.0 }
  0x86   :  { %44 = vadd.xlane.f32.xlu1 %v43_v20 }
  0xf1   :  { %v42_v22 = vpop.xlane.xlu1 %41 }
  0xf2   :  { %v46_v24 = vmul.f32 %v42_v22, %v33_v10 }
  0xf4   :  { %v48_v25 = vadd.f32 1e-05, %v46_v24 }
  0xf6   :  { %141 = vrsqrt.f32 %v48_v25  ;;  %vm56_vm3 = vweird.f32 %v48_v25 }
  0xf9   :  { %v45_v26 = vpop.xlane.xlu1 %44 }
  0xfa   :  { %v47_v27 = vmul.f32 %v45_v26, %v33_v10 }
  0xfc   :  { %v142_v28 = vpop.eup %141  ;;  %v49_v29 = vadd.f32 1e-05, %v47_v27 }
  0xfd   :  { %v51_v30 = vmul.f32 %v142_v28, %v48_v25  ;;  %vm57_vm2 = vweird.f32 %v142_v28 }
  0xfe   :  { %143 = vrsqrt.f32 %v49_v29  ;;  %vm58_vm4 = vmor %vm56_vm3, %vm57_vm2  ;;  %vm66_vm6 = vweird.f32 %v49_v29 }
  0xff   :  { %v52_v31 = vmul.f32 %v142_v28, %v51_v30 }
 0x101   :  { %v53_v32 = vmul.f32 0.5, %v52_v31 }
 0x103   :  { %v54_v33 = vsub.f32 1.5, %v53_v32 }
 0x104   :  { %v144_v34 = vpop.eup %143 }
 0x105   :  { %v55_v35 = vmul.f32 %v142_v28, %v54_v33  ;;  %v61_v36 = vmul.f32 %v144_v34, %v49_v29  ;;  %vm67_vm5 = vweird.f32 %v144_v34 }
 0x106   :  { %vm68_vm7 = vmor %vm66_vm6, %vm67_vm5 }
 0x107   :  { %v62_v37 = vmul.f32 %v144_v34, %v61_v36  ;;  %v59_v38 = vsel %vm58_vm4, %v142_v28, %v55_v35 }
 0x108   :  { %v70_v41 = vmul.f32 %v59_v38, %v36_v13 }
 0x109   :  { %v63_v39 = vmul.f32 0.5, %v62_v37 }
 0x10a   :  { %v76_v46 = vmul.f32 %v137_v42, %v70_v41 }
 0x10b   :  { %v64_v40 = vsub.f32 1.5, %v63_v39 }
 0x10c   :  { %v82_v49 = vadd.f32 %v138_v47, %v76_v46 }
 0x10d   :  { %v65_v43 = vmul.f32 %v144_v34, %v64_v40 }
 0x10f   :  { %v69_v44 = vsel %vm68_vm7, %v144_v34, %v65_v43 }
 0x110   :  { %v71_v45 = vmul.f32 %v69_v44, %v37_v18 }
 0x112   :  { %v77_v48 = vmul.f32 %v137_v42, %v71_v45 }
 0x114   :  { %v83_v50 = vadd.f32 %v138_v47, %v77_v48 }
 0x116   :  { %v84_v51 = vpack.c.bf16 %v83_v50, %v82_v49 }
 0x118   :  { %133 = vmatmul.msk.bf16.vlgmr.msra.gmra.mxu0 %vm20_vm0, %v84_v51 }
 0x195   :  { %v113_v52 = vpop.f32.mrf.mxu0 }
 0x196   :  { %119 = vst.msk [vmem:[%s204_s4] sm:$0xff] %vm118_vm8, %v113_v52 }
 0x19d   :  { %v115_v53 = vpop.f32.mrf.mxu0 }
 0x19e   :  { %120 = vst.msk [vmem:[%s204_s4 + $0x8] sm:$0xff] %vm118_vm8, %v115_v53 }

// kernel: _lambda_.25
= control target key start
LH: loop header
LB: loop body
LE: loop exit
PB: predicated region body
PF: predicated region fallthrough
CT: control target
= control target key end

     0   :  { %s781_s24 = smov 0   ;;  %s867_s0 = inlined_call_operand.vmem [shape: f32[2,8,32], index: 0, kind: input, shape index: {}]   ;;  %s868_s1 = inlined_call_operand.vmem [shape: f32[2,8,32], index: 1, kind: input, shape index: {}]   ;;  %s869_s2 = inlined_call_operand.vmem [shape: f32[2,8,32], index: 2, kind: input, shape index: {}]   ;;  %s870_s3 = inlined_call_operand.vmem [shape: f32[2,16,32], index: 3, kind: input, shape index: {}]   ;;  %s871_s4 = inlined_call_operand.vmem [shape: f32[2,16,32], index: 4, kind: input, shape index: {}]   ;;  %s872_s5 = inlined_call_operand.vmem [shape: f32[2,8,16], index: 5, kind: input, shape index: {}]   ;;  %s873_s6 = inlined_call_operand.vmem [shape: f32[2,8,8], index: 6, kind: input, shape index: {}]   ;;  %s874_s7 = inlined_call_operand.vmem [shape: f32[2,8,32], index: 7, kind: output, shape index: {}]  }
   0x1 LB: > { %s682_s25 = sadd.s32 4294967295, %s737_s24   ;;  %p686_p0 = scmp.ge.s32.totalorder %s737_s24, 1  ;;  %s737_s24 = sphi %s781_s24, %s17_s24  }
   0x2   : > { %p274_p1 = scmp.lt.s32.totalorder %s737_s24, 3 }
   0x4   : > { %p275_p2 = pnand %p686_p0, %p274_p1 }
   0x5   : > { %p322_p3 = scmp.lt.s32.totalorder (!%p275_p2), %s682_s25, 1  ;;  %s739_s14 = smov (!%p275_p2), 112  }
   0x6   : > { %278 = sbr.rel (%p275_p2) target bundleno = 805 (0x325), region = 48  ;;  %s740_s8 = smov (!%p275_p2), 16  }
   0xb   : > { %s876_s25 = smov (!%p322_p3, %s682_s25), 1  ;;  %vm362_vm0 = vcmask 130048   ;;  %v361_v9 = vld [vmem:[%s872_s5] sm:$0xff]  ;;  %vm402_vm1 = vcmask 64512   ;;  %vm425_vm2 = vcmask 1043456   ;;  %v701_v46 = vld [vmem:[%s873_s6 + $0x8] sm:$0xff] }
   0xc   : > { %s707_s26 = sshll.u32 %s876_s25, 4  ;;  %s793_s27 = sshll.u32 %s876_s25, 3  ;;  %v382_v13 = vld [vmem:[%s873_s6] sm:$0xff]  ;;  %v699_v47 = vld [vmem:[%s872_s5 + $0x8] sm:$0xff]  ;;  %vm579_vm3 = vcmask 261120  }
   0xd   : > { %s338_s30 = scalar_lea.vmem %s870_s3, %s707_s26  ;;  %s329_s10 = scalar_lea.vmem %s868_s1, %s793_s27 }
   0xe   : > { %v352_v0 = vld [vmem:[%s338_s30] sm:$0xff]  ;;  %v353_v1 = vld [vmem:[%s338_s30 + $0x8] sm:$0xff]  ;;  %s325_s13 = scalar_lea.vmem %s867_s0, %s793_s27  ;;  %s333_s21 = scalar_lea.vmem %s869_s2, %s793_s27 }
   0xf   : > { %v350_v2 = vld [vmem:[%s329_s10] sm:$0xff]  ;;  %v359_v3 = vpack.c.bf16 %v353_v1, %v352_v0  ;;  %s343_s28 = scalar_lea.vmem %s871_s4, %s707_s26  ;;  %s347_s11 = scalar_lea.vmem %s874_s7, %s793_s27 }
  0x10   : > { %v357_v4 = vpack.c.bf16 %v350_v2, %v350_v2  ;;  %v349_v7 = vld [vmem:[%s325_s13] sm:$0xff]  ;;  %v355_v21 = vld [vmem:[%s343_s28 + $0x8] sm:$0xff] }
  0x11   : > { %v367_v5 = vsel %vm362_vm0, %v359_v3, 0  ;;  %v356_v8 = vpack.c.bf16 %v349_v7, %v349_v7  ;;  %466 = vrot.lane.b32.xlu1 %v359_v3, %s739_s14  ;;  %v351_v19 = vld [vmem:[%s333_s21] sm:$0xff] }
  0x12   : > { %v384_v6 = vsel %vm362_vm0, %v357_v4, 0  ;;  %376 = vmatpush.bf16.xpose.msra.mxu0 %v367_v5  ;;  %v354_v20 = vld [vmem:[%s343_s28] sm:$0xff]  ;;  %v358_v23 = vpack.c.bf16 %v351_v19, %v351_v19 }
  0x13   : > { %393 = vmatpush.bf16.xpose.msra.mxu1 %v384_v6  ;;  %463 = vrot.lane.b32.xlu2 %v356_v8, %s739_s14  ;;  %v360_v24 = vpack.c.bf16 %v355_v21, %v354_v20 }
  0x14   : > { %v427_v25 = vsel %vm425_vm2, %v358_v23, 0 }
  0x15   : > { %452 = vmatpush.bf16.msra.mxu3 %v360_v24  ;;  %436 = vmatpush.bf16.msra.mxu2 %v427_v25 }
  0x19   : > { %695 = vmatmul.msk.bf16.vlgmr.msra.gmra.mxu0 %vm362_vm0, %v356_v8  ;;  %490 = vrot.lane.b32.xlu1 %v357_v4, %s739_s14 }
  0x1a   : > { %696 = vmatmul.msk.bf16.vlgmr.msra.gmra.mxu1 %vm362_vm0, %v356_v8 }
  0x21   : > { %531 = vrot.lane.b32.xlu1 %v358_v23, %s739_s14 }
  0x6d   : > { %v464_v40 = vpop.permute.xlu2 %463 }
  0x83   : > { %v467_v22 = vpop.permute.xlu1 %466 }
  0x84   : > { %v472_v26 = vsel %vm362_vm0, %v467_v22, 0 }
  0x85   : > { %481 = vmatpush.bf16.xpose.msrb.mxu2 %v472_v26 }
  0x8b   : > { %v491_v27 = vpop.permute.xlu1 %490 }
  0x8c   : > { %v493_v28 = vsel %vm362_vm0, %v491_v27, 0 }
  0x8d   : > { %502 = vmatpush.bf16.xpose.msrb.mxu3 %v493_v28 }
  0x93   : > { %v532_v58 = vpop.permute.xlu1 %531 }
  0x94   : > { %v537_v59 = vsel %vm425_vm2, %v532_v58, 0 }
  0x95   : > { %546 = vmatpush.bf16.msrb.mxu0 %v537_v59 }
  0x96   : > { %v378_v10 = vpop.f32.mrf.mxu0 }
  0x97   : > { %v395_v11 = vpop.f32.mrf.mxu1  ;;  %v379_v12 = vadd.f32 %v378_v10, %v361_v9 }
  0x98   : > { %v396_v15 = vadd.f32 %v395_v11, %v382_v13 }
  0x99   : > { %v399_v14 = vsel %vm362_vm0, %v379_v12, -inf }
  0x9a   : > { %400 = vmax.xlane.f32.xlu0 %v399_v14  ;;  %v403_v18 = vsel %vm402_vm1, %v396_v15, -inf }
  0x9e   : > { %v380_v16 = vpop.f32.mrf.mxu0 }
  0x9f   : > { %v397_v17 = vpop.f32.mrf.mxu1 }
  0xa2   : > { %404 = vmax.xlane.f32.xlu0 %v403_v18 }
 0x10d   : > { %v401_v29 = vpop.xlane.xlu0 %400 }
 0x115   : > { %v405_v30 = vpop.xlane.xlu0 %404 }
 0x116   : > { %v406_v31 = vmax.f32 %v401_v29, %v405_v30 }
 0x118   : > { %v407_v32 = vsub.f32 %v379_v12, %v406_v31  ;;  %v410_v33 = vsub.f32 %v396_v15, %v406_v31 }
 0x11a   : > { %v408_v34 = vmul.f32 1.442695, %v407_v32  ;;  %v411_v35 = vmul.f32 1.442695, %v410_v33 }
 0x11c   : > { %719 = vpow2.f32 %v408_v34 }
 0x11d   : > { %721 = vpow2.f32 %v411_v35 }
 0x122   : > { %v720_v36 = vpop.eup %719 }
 0x123   : > { %v722_v37 = vpop.eup %721  ;;  %v420_v38 = vpack.c.bf16 %v720_v36, %v720_v36  ;;  %v413_v56 = vsel %vm362_vm0, %v720_v36, 0.0 }
 0x124   : > { %v421_v39 = vpack.c.bf16 %v722_v37, %v722_v37  ;;  %v416_v57 = vsel %vm402_vm1, %v722_v37, 0.0 }
 0x125   : > { %698 = vmatmul.msk.bf16.vlgmr.msra.gmra.mxu3 %vm362_vm0, %v420_v38 }
 0x126   : > { %697 = vmatmul.msk.bf16.vlgmr.msra.gmra.mxu2 %vm402_vm1, %v421_v39 }
 0x135   : > { %702 = vmatmul.msk.bf16.vlgmr.msrb.gmra.mxu3 %vm362_vm0, %v464_v40 }
 0x136   : > { %700 = vmatmul.msk.bf16.vlgmr.msrb.gmra.mxu2 %vm362_vm0, %v464_v40 }
 0x1a8   : > { %v454_v41 = vpop.f32.mrf.mxu3 }
 0x1a9   : > { %v438_v42 = vpop.f32.mrf.mxu2 }
 0x1aa   : > { %v840_v43 = vadd.f32 %v454_v41, %v438_v42 }
 0x1b0   : > { %v456_v44 = vpop.f32.mrf.mxu3 }
 0x1b1   : > { %v440_v45 = vpop.f32.mrf.mxu2 }
 0x1b8   : > { %v504_v48 = vpop.f32.mrf.mxu3 }
 0x1b9   : > { %v483_v49 = vpop.f32.mrf.mxu2  ;;  %v505_v50 = vadd.f32 %v701_v46, %v504_v48 }
 0x1ba   : > { %v484_v51 = vadd.f32 %v699_v47, %v483_v49 }
 0x1bb   : > { %v511_v52 = vsel %vm402_vm1, %v505_v50, -inf }
 0x1bc   : > { %v508_v53 = vsel %vm362_vm0, %v484_v51, -inf  ;;  %512 = vmax.xlane.f32.xlu0 %v511_v52 }
 0x1bd   : > { %509 = vmax.xlane.f32.xlu2 %v508_v53 }
 0x1c0   : > { %v506_v54 = vpop.f32.mrf.mxu3 }
 0x1c1   : > { %v485_v55 = vpop.f32.mrf.mxu2 }
 0x1c5   : > { %414 = vadd.xlane.f32.xlu2 %v413_v56 }
 0x1cd   : > { %417 = vadd.xlane.f32.xlu2 %v416_v57 }
 0x1d0   : > { %553 = vrot.lane.b32.xlu0 %v360_v24, %s739_s14 }
 0x22f   : > { %v513_v60 = vpop.xlane.xlu0 %512 }
 0x230   : > { %v510_v61 = vpop.xlane.xlu2 %509 }
 0x231   : > { %v514_v62 = vmax.f32 %v510_v61, %v513_v60 }
 0x233   : > { %v515_v63 = vsub.f32 %v484_v51, %v514_v62  ;;  %v518_v0 = vsub.f32 %v505_v50, %v514_v62 }
 0x235   : > { %v516_v1 = vmul.f32 1.442695, %v515_v63  ;;  %v519_v2 = vmul.f32 1.442695, %v518_v0 }
 0x237   : > { %723 = vpow2.f32 %v516_v1 }
 0x238   : > { %725 = vpow2.f32 %v519_v2  ;;  %v415_v20 = vpop.xlane.xlu2 %414 }
 0x23d   : > { %v724_v3 = vpop.eup %723 }
 0x23e   : > { %v726_v4 = vpop.eup %725  ;;  %v521_v5 = vsel %vm362_vm0, %v724_v3, 0.0  ;;  %v528_v9 = vpack.c.bf16 %v724_v3, %v724_v3 }
 0x23f   : > { %v524_v6 = vsel %vm402_vm1, %v726_v4, 0.0  ;;  %522 = vadd.xlane.f32.xlu1 %v521_v5  ;;  %v529_v7 = vpack.c.bf16 %v726_v4, %v726_v4 }
 0x240   : > { %525 = vadd.xlane.f32.xlu0 %v524_v6  ;;  %v418_v21 = vpop.xlane.xlu2 %417 }
 0x241   : > { %703 = vmatmul.msk.bf16.vlgmr.msrb.gmra.mxu0 %vm402_vm1, %v529_v7  ;;  %v419_v22 = vadd.f32 %v418_v21, %v415_v20 }
 0x242   : > { %v554_v8 = vpop.permute.xlu0 %553 }
 0x243   : > { %566 = vmatpush.bf16.msrb.mxu1 %v554_v8 }
 0x246   : > { %704 = vmatmul.msk.bf16.vlgmr.msrb.gmra.mxu1 %vm362_vm0, %v528_v9 }
 0x2b2   : > { %v523_v10 = vpop.xlane.xlu1 %522 }
 0x2b3   : > { %v526_v11 = vpop.xlane.xlu0 %525 }
 0x2b4   : > { %v527_v12 = vadd.f32 %v526_v11, %v523_v10 }
 0x2b6   : > { %727 = vrcp.f32 %v527_v12 }
 0x2b7   : > { %729 = vrcp.f32 %v419_v22 }
 0x2bc   : > { %v728_v16 = vpop.eup %727 }
 0x2bd   : > { %v730_v23 = vpop.eup %729 }
 0x2be   : > { %v548_v13 = vpop.f32.mrf.mxu0  ;;  %v459_v24 = vmul.f32 %v730_v23, %v840_v43 }
 0x2c3   : > { %v568_v14 = vpop.f32.mrf.mxu1 }
 0x2c4   : > { %v569_v15 = vadd.f32 %v568_v14, %v548_v13 }
 0x2c6   : > { %v573_v17 = vmul.f32 %v728_v16, %v569_v15  ;;  %v550_v18 = vpop.f32.mrf.mxu0 }
 0x2c8   : > { %575 = vrot.lane.b32.xlu2 %v573_v17, %s740_s8 }
 0x2cb   : > { %v570_v19 = vpop.f32.mrf.mxu1 }
 0x322   : > { %v576_v25 = vpop.permute.xlu2 %575 }
 0x323   : > { %v578_v26 = vsel %vm362_vm0, %v459_v24, %v576_v25 }
 0x324   : > { %580 = vst.msk [vmem:[%s347_s11] sm:$0xff] %vm579_vm3, %v578_v26 }
 0x325 PF: > { %s17_s24 = sadd.s32 1, %s737_s24  }
 0x326   : > { %p14_p4 = scmp.ge.s32.totalorder %s17_s24, 4  }
 0x328   :  { %16 = sbr.rel (!%p14_p4) target bundleno = 1 (0x1), region = 92 }

// kernel: _lambda_.28
= control target key start
LH: loop header
LB: loop body
LE: loop exit
PB: predicated region body
PF: predicated region fallthrough
CT: control target
= control target key end

     0   :  { %vm57_vm0 = vcmask 523264   ;;  %vm79_vm1 = vcmask 261120   ;;  %s166_s1 = inlined_call_operand.vmem [shape: bf16[64,32], index: 1, kind: input, shape index: {}]   ;;  %s167_s2 = inlined_call_operand.vmem [shape: f32[1,32], index: 2, kind: input, shape index: {}]   ;;  %s168_s0 = inlined_call_operand.vmem [shape: f32[16,64], index: 0, kind: input, shape index: {}]   ;;  %s169_s3 = inlined_call_operand.vmem [shape: f32[16,32], index: 3, kind: input, shape index: {}]   ;;  %s170_s4 = inlined_call_operand.vmem [shape: f32[16,32], index: 4, kind: output, shape index: {}]  }
   0x1   :  { %v106_v0 = vld [vmem:[%s166_s1 + $0x18] sm:$0xff]  ;;  %v105_v1 = vld [vmem:[%s166_s1 + $0x10] sm:$0xff]  ;;  %v104_v2 = vld [vmem:[%s166_s1 + $0x8] sm:$0xff] }
   0x2   :  { %65 = vmatpush.bf16.msra.mxu0 %v106_v0  ;;  %v103_v3 = vld [vmem:[%s166_s1] sm:$0xff]  ;;  %v19_v5 = vld [vmem:[%s168_s0 + $0x8] sm:$0xff] }
   0x3   :  { %v18_v4 = vld [vmem:[%s168_s0] sm:$0xff]  ;;  %v76_v13 = vld [vmem:[%s169_s3 + $0x8] sm:$0xff] }
   0x4   :  { %v20_v6 = vpack.c.bf16 %v19_v5, %v18_v4  ;;  %v107_v7 = vld [vmem:[%s167_s2] ss:$0 sm:$0xff] }
   0x5   :  { %v75_v9 = vld [vmem:[%s169_s3] sm:$0xff] }
   0x6   :  { %66 = vmatpush.bf16.msra.mxu0 %v105_v1 }
   0xa   :  { %67 = vmatpush.bf16.msra.mxu0 %v104_v2 }
   0xe   :  { %68 = vmatpush.bf16.msra.mxu0 %v103_v3 }
  0x11   :  { %102 = vmatmul.msk.bf16.vlgmr.msra.gmra.mxu0 %vm57_vm0, %v20_v6 }
  0x8e   :  { %v70_v8 = vpop.f32.mrf.mxu0 }
  0x8f   :  { %v71_v10 = vadd.f32 %v107_v7, %v70_v8 }
  0x91   :  { %v77_v11 = vadd.f32 %v75_v9, %v71_v10 }
  0x93   :  { %80 = vst.msk [vmem:[%s170_s4] sm:$0xff] %vm79_vm1, %v77_v11 }
  0x96   :  { %v72_v12 = vpop.f32.mrf.mxu0 }
  0x97   :  { %v73_v14 = vadd.f32 %v107_v7, %v72_v12 }
  0x99   :  { %v78_v15 = vadd.f32 %v76_v13, %v73_v14 }
  0x9b   :  { %81 = vst.msk [vmem:[%s170_s4 + $0x8] sm:$0xff] %vm79_vm1, %v78_v15 }

// kernel: _lambda_.34
= control target key start
LH: loop header
LB: loop body
LE: loop exit
PB: predicated region body
PF: predicated region fallthrough
CT: control target
= control target key end

     0   :  { %v71_v0 = vmov 0   ;;  %vm52_vm0 = vcmask 261120   ;;  %s120_s0 = inlined_call_operand.vmem [shape: f32[3,1,1], index: 0, kind: input, shape index: {}]   ;;  %s121_s1 = inlined_call_operand.vmem [shape: f32[3,16,32], index: 1, kind: input, shape index: {}]   ;;  %s122_s2 = inlined_call_operand.vmem [shape: f32[16,32], index: 2, kind: output, shape index: {}]  }
   0x1   :  { %66 = vset.pattern.permute.xlu0 %v71_v0  ;;  %v68_v1 = vld [vmem:[%s120_s0] ss:$0 sm:$0xff]  ;;  %67 = vset.pattern.permute.xlu1 %v71_v0  ;;  %v70_v2 = vld [vmem:[%s120_s0 + $0x2] ss:$0 sm:$0xff]  ;;  %v69_v3 = vld [vmem:[%s120_s0 + $0x1] ss:$0 sm:$0xff] }
   0x2   :  { %17 = vperm.xlu0 %66, %v68_v1   ;;  %45 = vperm.xlu1 %67, %v70_v2   ;;  %v11_v5 = vld [vmem:[%s121_s1] sm:$0xff]  ;;  %v12_v6 = vld [vmem:[%s121_s1 + $0x8] sm:$0xff]  ;;  %v59_v7 = vld [vmem:[%s121_s1 + $0x10] sm:$0xff] }
   0x3   :  { %v60_v8 = vld [vmem:[%s121_s1 + $0x18] sm:$0xff]  ;;  %v62_v9 = vld [vmem:[%s121_s1 + $0x20] sm:$0xff]  ;;  %v63_v10 = vld [vmem:[%s121_s1 + $0x28] sm:$0xff] }
   0xa   :  { %30 = vperm.xlu0 %66, %v69_v3  }
  0x74   :  { %v18_v4 = vpop.permute.xlu0 %17  ;;  %v46_v11 = vpop.permute.xlu1 %45 }
  0x75   :  { %v20_v12 = vmul.f32 %v18_v4, %v11_v5  ;;  %v21_v13 = vmul.f32 %v18_v4, %v12_v6  ;;  %v48_v17 = vmul.f32 %v62_v9, %v46_v11  ;;  %v49_v18 = vmul.f32 %v63_v10, %v46_v11 }
  0x7c   :  { %v31_v14 = vpop.permute.xlu0 %30 }
  0x7d   :  { %v33_v15 = vmul.f32 %v59_v7, %v31_v14  ;;  %v34_v16 = vmul.f32 %v60_v8, %v31_v14 }
  0x7f   :  { %v35_v19 = vadd.f32 %v33_v15, %v20_v12  ;;  %v36_v20 = vadd.f32 %v34_v16, %v21_v13 }
  0x81   :  { %v50_v21 = vadd.f32 %v48_v17, %v35_v19  ;;  %v51_v22 = vadd.f32 %v49_v18, %v36_v20 }
  0x83   :  { %53 = vst.msk [vmem:[%s122_s2] sm:$0xff] %vm52_vm0, %v50_v21 }
  0x84   :  { %54 = vst.msk [vmem:[%s122_s2 + $0x8] sm:$0xff] %vm52_vm0, %v51_v22 }

// kernel: _lambda_.35
= control target key start
LH: loop header
LB: loop body
LE: loop exit
PB: predicated region body
PF: predicated region fallthrough
CT: control target
= control target key end

     0   :  { %vm31_vm0 = vcmask 261120   ;;  %vm49_vm1 = vcmask 523264   ;;  %s100_s1 = inlined_call_operand.vmem [shape: bf16[32,64], index: 1, kind: input, shape index: {}]   ;;  %s101_s0 = inlined_call_operand.vmem [shape: f32[16,32], index: 0, kind: input, shape index: {}]   ;;  %s102_s2 = inlined_call_operand.vmem [shape: f32[16,64], index: 2, kind: output, shape index: {}]  }
   0x1   :  { %v66_v0 = vld [vmem:[%s100_s1 + $0x8] sm:$0xff]  ;;  %v65_v1 = vld [vmem:[%s100_s1] sm:$0xff] }
   0x2   :  { %41 = vmatpush.bf16.msra.mxu0 %v66_v0  ;;  %v12_v2 = vld [vmem:[%s101_s0] sm:$0xff]  ;;  %v13_v3 = vld [vmem:[%s101_s0 + $0x8] sm:$0xff] }
   0x3   :  { %v14_v4 = vpack.c.bf16 %v13_v3, %v12_v2 }
   0x6   :  { %42 = vmatpush.bf16.msra.mxu0 %v65_v1 }
   0x9   :  { %64 = vmatmul.msk.bf16.vlgmr.msra.gmra.mxu0 %vm31_vm0, %v14_v4 }
  0x86   :  { %v44_v5 = vpop.f32.mrf.mxu0 }
  0x87   :  { %50 = vst.msk [vmem:[%s102_s2] sm:$0xff] %vm49_vm1, %v44_v5 }
  0x8e   :  { %v46_v6 = vpop.f32.mrf.mxu0 }
  0x8f   :  { %51 = vst.msk [vmem:[%s102_s2 + $0x8] sm:$0xff] %vm49_vm1, %v46_v6 }

</bundles_post_ra>
